<compile_context>
chip_gen: v5e
topology: v5e:2x2
jax: 0.10.0
libtpu: 0.0.40
codegen_flags: <defaults>
</compile_context>

<pallas_src>
import functools

import jax
import jax.numpy as jnp
from jax.experimental import pallas as pl
from jax.experimental.pallas import tpu as pltpu

EPS = 1e-5

# Review: bf16 streaming/MXU inputs pay off on v6e/v7x.  Kept f32 here so the
# forward matches the f32 PyTorch module to tight tolerance.
COMPUTE_DTYPE = jnp.float32

_PADW = 8  # sublane-aligned halo width of the conv2 scratch buffer


def _tap_loc(kh, kw, stride):
    """Static (plane, row-offset, col-offset) of conv tap (kh, kw).

    stride == 1: single zero-padded plane; tap offset is (kh, kw).
    stride == 2: four parity planes xp[:, ph::2, pw::2, :]; every tap of a
                 stride-2 3x3 conv is a contiguous slice of one parity plane.
    """
    if stride == 1:
        return 0, kh, kw
    return (kh % 2) * 2 + (kw % 2), kh // 2, kw // 2


def _fused_block_kernel(x_ref, w1_ref, w2_ref, bnp_ref, o_ref,
                        y1_ref, y2_ref, stats_ref, pad_ref, *,
                        stride, n_imgs, hp, ho, wo, cin, cout, pad_lo):
    """Phases (grid dim 0):
         0: conv1(x_n) -> stash raw, accumulate bn1 sum / sumsq
         1: finalize bn1 -> relu -> conv2 -> stash raw, accumulate bn2 sums
         2: finalize bn2 -> + zero-padded skip -> relu -> write output

       stats_ref rows: 0 sum1, 1 sumsq1, 2 sum2, 3 sumsq2,
                       4 scale1, 5 shift1, 6 scale2, 7 shift2
    """
    p = pl.program_id(0)          # phase
    n = pl.program_id(1)          # image index
    mo = ho * wo
    inv_m = 1.0 / float(n_imgs * mo)
    cdt = COMPUTE_DTYPE

    def x_tap(kh, kw):
        pi, ro, co = _tap_loc(kh, kw, stride)
        base = pi * hp
        return x_ref[0, base + ro: base + ro + ho, co: co + wo, :]

    def conv_taps(load_tap, w_ref, cin_):
        acc = jnp.zeros((mo, cout), jnp.float32)
        for t in range(9):                       # static unroll, 9 MXU matmuls
            kh, kw = t // 3, t % 3
            tap = load_tap(kh, kw).reshape(mo, cin_)
            acc += jnp.dot(tap.astype(cdt), w_ref[t].astype(cdt),
                           preferred_element_type=jnp.float32)
        return acc

    # ------------- phase 0: conv1, accumulate bn1 statistics ---------------
    @pl.when(p == 0)
    def _():
        @pl.when(n == 0)
        def _():
            stats_ref[...] = jnp.zeros_like(stats_ref)

        y = conv_taps(x_tap, w1_ref, cin)
        y1_ref[n] = y
        stats_ref[0:1, :] += jnp.sum(y, axis=0, keepdims=True)
        stats_ref[1:2, :] += jnp.sum(y * y, axis=0, keepdims=True)

    # ------- phase 1: finalize bn1, relu, conv2, accumulate bn2 stats ------
    @pl.when(p == 1)
    def _():
        @pl.when(n == 0)
        def _():
            mean = stats_ref[0:1, :] * inv_m
            var = stats_ref[1:2, :] * inv_m - mean * mean
            scale = bnp_ref[0:1, :] * jax.lax.rsqrt(var + EPS)
            stats_ref[4:5, :] = scale
            stats_ref[5:6, :] = bnp_ref[1:2, :] - mean * scale
            stats_ref[2:3, :] = jnp.zeros((1, cout), jnp.float32)
            stats_ref[3:4, :] = jnp.zeros((1, cout), jnp.float32)
            pad_ref[...] = jnp.zeros_like(pad_ref)   # zero halo once; interior
                                                     # is overwritten per image

        y1 = jnp.maximum(y1_ref[n] * stats_ref[4:5, :] + stats_ref[5:6, :], 0.0)
        # interior write is sublane-aligned (_PADW is a multiple of 8)
        pad_ref[1:ho + 1, _PADW:_PADW + wo, :] = y1.reshape(ho, wo, cout)

        def y1_tap(kh, kw):
            c0 = _PADW - 1 + kw
            return pad_ref[kh: kh + ho, c0: c0 + wo, :]

        y = conv_taps(y1_tap, w2_ref, cout)
        y2_ref[n] = y
        stats_ref[2:3, :] += jnp.sum(y, axis=0, keepdims=True)
        stats_ref[3:4, :] += jnp.sum(y * y, axis=0, keepdims=True)

    # ---------- phase 2: finalize bn2, add zero-padded skip, relu ----------
    @pl.when(p == 2)
    def _():
        @pl.when(n == 0)
        def _():
            mean = stats_ref[2:3, :] * inv_m
            var = stats_ref[3:4, :] * inv_m - mean * mean
            scale = bnp_ref[2:3, :] * jax.lax.rsqrt(var + EPS)
            stats_ref[6:7, :] = scale
            stats_ref[7:8, :] = bnp_ref[3:4, :] - mean * scale

        y2 = y2_ref[n] * stats_ref[6:7, :] + stats_ref[7:8, :]

        # Option-A skip: the center tap IS x[:, ::stride, ::stride]; embed its
        # Cin channels into [pad_lo, pad_lo + Cin) of Cout via a tiny selection
        # matmul (no padded skip tensor in HBM).
        skip_cin = x_tap(1, 1).reshape(mo, cin)
        row = jax.lax.broadcasted_iota(jnp.int32, (cin, cout), 0)
        col = jax.lax.broadcasted_iota(jnp.int32, (cin, cout), 1)
        sel = (col == row + pad_lo).astype(jnp.float32)
        skip = jnp.dot(skip_cin, sel, preferred_element_type=jnp.float32)

        o_ref[0] = jnp.maximum(y2 + skip, 0.0).reshape(ho, wo, cout)


def residual_block_forward(x_nchw, params, stride):
    """Full ResidualBlock forward.  Input/output NCHW like PyTorch."""
    w1, g1, b1, w2, g2, b2 = params
    n_imgs, cin, h, w = x_nchw.shape
    cout = w1.shape[-1]
    assert stride in (1, 2), "ResNet-56 blocks use stride 1 or 2"
    assert cin <= cout, "option-A skip assumes Cin <= Cout"
    if stride == 2:
        assert h % 2 == 0 and w % 2 == 0
    ho, wo = h // stride, w // stride

    x = jnp.transpose(x_nchw, (0, 2, 3, 1)).astype(jnp.float32)     # -> NHWC
    xp = jnp.pad(x, ((0, 0), (1, 1), (1, 1), (0, 0)))
    if stride == 1:
        planes = xp[:, None]                                # (N, 1, H+2, W+2, C)
    else:
        planes = jnp.stack([xp[:, ph::2, pw::2, :]
                            for ph in (0, 1) for pw in (0, 1)], axis=1)
    n_planes, hp, wp = planes.shape[1], planes.shape[2], planes.shape[3]
    x_planes = planes.reshape(n_imgs, n_planes * hp, wp, cin)

    w1m = w1.reshape(9, cin, cout).astype(jnp.float32)
    w2m = w2.reshape(9, cout, cout).astype(jnp.float32)
    bnp = jnp.stack([g1, b1, g2, b2]).astype(jnp.float32)            # (4, Cout)
    pad_lo = (cout - cin) // 2

    kernel = functools.partial(
        _fused_block_kernel, stride=stride, n_imgs=n_imgs, hp=hp,
        ho=ho, wo=wo, cin=cin, cout=cout, pad_lo=pad_lo)

    # TODO(synk): for very large N*Ho*Wo*C the VMEM stash of raw conv outputs
    # should move to an HBM scratch with manual double-buffered DMA.
    out_nhwc = pl.pallas_call(
        kernel,
        out_shape=jax.ShapeDtypeStruct((n_imgs, ho, wo, cout), jnp.float32),
        grid=(3, n_imgs),
        in_specs=[
            # x planes: streamed per image; phase 1 never reads x -> park on
            # block 0 so it is not re-fetched during that phase.
            pl.BlockSpec((1, n_planes * hp, wp, cin),
                         lambda p, n: (jnp.where(p == 1, 0, n), 0, 0, 0)),
            # weights / BN params: constant index_map -> DMA'd once, resident.
            pl.BlockSpec((9, cin, cout), lambda p, n: (0, 0, 0)),
            pl.BlockSpec((9, cout, cout), lambda p, n: (0, 0, 0)),
            pl.BlockSpec((4, cout), lambda p, n: (0, 0)),
        ],
        # Output is only produced in phase 2; in earlier phases map to block 0
        # so no garbage block is ever written back to HBM.
        out_specs=pl.BlockSpec((1, ho, wo, cout),
                               lambda p, n: (jnp.where(p == 2, n, 0), 0, 0, 0)),
        scratch_shapes=[
            pltpu.VMEM((n_imgs, ho * wo, cout), jnp.float32),   # raw conv1 stash
            pltpu.VMEM((n_imgs, ho * wo, cout), jnp.float32),   # raw conv2 stash
            pltpu.VMEM((8, cout), jnp.float32),                 # BN sums / scale / shift
            pltpu.VMEM((ho + 2, wo + 2 * _PADW, cout), jnp.float32),  # conv2 halo buf
        ],
        compiler_params=pltpu.CompilerParams(
            # Both axes must be 'arbitrary': phases are strictly ordered and
            # the BN-statistics accumulation makes the image axis sequential.
            dimension_semantics=("arbitrary", "arbitrary"),
            vmem_limit_bytes=48 * 1024 * 1024),
    )(x_planes, w1m, w2m, bnp)

    return jnp.transpose(out_nhwc, (0, 3, 1, 2))                     # -> NCHW


# TODO(synk): BatchNorm running-stat updates (running_mean/var, momentum) are
# stateful training bookkeeping and do not affect this forward output; omitted.


# --------------------------- pure-JAX reference -----------------------------

def _pad_channels(x_nhwc, out_channels, stride):
    missing = out_channels - x_nhwc.shape[-1]
    if missing < 0:
        return x_nhwc
    xs = x_nhwc[:, ::stride, ::stride, :]
    half = missing // 2
    xs = jnp.pad(xs, ((0, 0), (0, 0), (0, 0), (half, half)))
    rest = out_channels - xs.shape[-1]
    if rest > 0:
        xs = jnp.pad(xs, ((0, 0), (0, 0), (0, 0), (0, rest)))
    return xs


def _reference(x_nchw, params, stride):
    w1, g1, b1, w2, g2, b2 = params
    cout = w1.shape[-1]
    x = jnp.transpose(x_nchw, (0, 2, 3, 1)).astype(jnp.float32)

    def conv(x, w, s):
        return jax.lax.conv_general_dilated(
            x, w, window_strides=(s, s), padding=((1, 1), (1, 1)),
            dimension_numbers=("NHWC", "HWIO", "NHWC"))

    def bn(y, g, b):
        mean = jnp.mean(y, axis=(0, 1, 2), keepdims=True)
        var = jnp.mean(jnp.square(y - mean), axis=(0, 1, 2), keepdims=True)
        return (y - mean) * jax.lax.rsqrt(var + EPS) * g + b

    y = jax.nn.relu(bn(conv(x, w1, stride), g1, b1))
    y = bn(conv(y, w2, 1), g2, b2)
    y = jax.nn.relu(y + _pad_channels(x, cout, stride))
    return jnp.transpose(y, (0, 3, 1, 2))


# ---------------------------------- main ------------------------------------

if __name__ == "__main__":
    configs = [
        # (N, Cin, H, W, Cout, stride)
        (2, 4, 16, 16, 8, 2),    # down-sampling block (option-A padded skip)
        (2, 8, 16, 16, 8, 1),    # identity-skip block
    ]
    key = jax.random.PRNGKey(0)
    for (N, Cin, H, W, Cout, stride) in configs:
        key, kx, kw1, kw2, kg1, kb1, kg2, kb2 = jax.random.split(key, 8)
        x = jax.random.normal(kx, (N, Cin, H, W), jnp.float32)

        w1 = jax.random.normal(kw1, (3, 3, Cin, Cout), jnp.float32) * (1.0 / (3 * Cin ** 0.5))
        w2 = jax.random.normal(kw2, (3, 3, Cout, Cout), jnp.float32) * (1.0 / (3 * Cout ** 0.5))
        g1 = 1.0 + 0.1 * jax.random.normal(kg1, (Cout,), jnp.float32)
        b1 = 0.1 * jax.random.normal(kb1, (Cout,), jnp.float32)
        g2 = 1.0 + 0.1 * jax.random.normal(kg2, (Cout,), jnp.float32)
        b2 = 0.1 * jax.random.normal(kb2, (Cout,), jnp.float32)
        params = (w1, g1, b1, w2, g2, b2)

        fwd = jax.jit(functools.partial(residual_block_forward, stride=stride))
        out = jax.block_until_ready(fwd(x, params))
        ref = jax.block_until_ready(_reference(x, params, stride))

        assert out.shape == (N, Cout, H // stride, W // stride), out.shape
        err = float(jnp.max(jnp.abs(out - ref)))
        assert jnp.allclose(out, ref, rtol=2e-3, atol=2e-3), err

    print("KERNEL_OK")
</pallas_src>

<mosaic_0001>
module attributes {stable_mosaic.version = 11 : i64} {
  func.func @_fused_block_kernel(%arg0: i32, %arg1: i32, %arg2: memref<1x36x9x4xf32, #tpu.memory_space<vmem>>, %arg3: memref<9x4x8xf32, #tpu.memory_space<vmem>>, %arg4: memref<9x8x8xf32, #tpu.memory_space<vmem>>, %arg5: memref<4x8xf32, #tpu.memory_space<vmem>>, %arg6: memref<1x8x8x8xf32, #tpu.memory_space<vmem>>, %arg7: memref<2x64x8xf32, #tpu.memory_space<vmem>>, %arg8: memref<2x64x8xf32, #tpu.memory_space<vmem>>, %arg9: memref<8x8xf32, #tpu.memory_space<vmem>>, %arg10: memref<10x24x8xf32, #tpu.memory_space<vmem>>) attributes {dimension_semantics = [#tpu.dimension_semantics<arbitrary>, #tpu.dimension_semantics<arbitrary>], iteration_bounds = array<i64: 3, 2>, scalar_prefetch = 0 : i64, scratch_operands = 4 : i64, tpu.core_type = #tpu.core_type<tc>, window_params = [{transform_indices = @transform_0, window_bounds = array<i64: 1, 36, 9, 4>}, {pipeline_mode = #tpu.pipeline_mode<synchronous>, transform_indices = @transform_1, window_bounds = array<i64: 9, 4, 8>}, {pipeline_mode = #tpu.pipeline_mode<synchronous>, transform_indices = @transform_2, window_bounds = array<i64: 9, 8, 8>}, {pipeline_mode = #tpu.pipeline_mode<synchronous>, transform_indices = @transform_3, window_bounds = array<i64: 4, 8>}, {transform_indices = @transform_4, window_bounds = array<i64: 1, 8, 8, 8>}]} {
    %c0_i32 = arith.constant 0 : i32
    %0 = arith.cmpi eq, %arg0, %c0_i32 : i32
    %1 = arith.extui %0 : i1 to i32
    %c0_i32_0 = arith.constant 0 : i32
    %2 = arith.cmpi ne, %1, %c0_i32_0 : i32
    scf.if %2 {
      %c0_i32_3 = arith.constant 0 : i32
      %9 = arith.cmpi eq, %arg1, %c0_i32_3 : i32
      %10 = arith.extui %9 : i1 to i32
      %c0_i32_4 = arith.constant 0 : i32
      %11 = arith.cmpi ne, %10, %c0_i32_4 : i32
      scf.if %11 {
        %cst_76 = arith.constant 0.000000e+00 : f32
        %91 = vector.broadcast %cst_76 : f32 to vector<8x8xf32>
        %c0_77 = arith.constant 0 : index
        %c0_78 = arith.constant 0 : index
        %92 = vector.load %arg9[%c0_77, %c0_78] : memref<8x8xf32, #tpu.memory_space<vmem>>, vector<8x8xf32>
        tpu.vector_store %arg9[%c0_77, %c0_78], %91 {strides = array<i32>} : memref<8x8xf32, #tpu.memory_space<vmem>>, vector<8x8xf32>,
      } else {
      }
      %cst = arith.constant 0.000000e+00 : f32
      %12 = vector.broadcast %cst : f32 to vector<64x8xf32>
      %c0 = arith.constant 0 : index
      %c0_5 = arith.constant 0 : index
      %c0_6 = arith.constant 0 : index
      %c0_7 = arith.constant 0 : index
      %13 = vector.load %arg2[%c0, %c0_5, %c0_6, %c0_7] : memref<1x36x9x4xf32, #tpu.memory_space<vmem>>, vector<1x8x8x4xf32>
      %14 = vector.shape_cast %13 : vector<1x8x8x4xf32> to vector<8x8x4xf32>
      %15 = vector.shape_cast %14 : vector<8x8x4xf32> to vector<64x4xf32>
      %c0_8 = arith.constant 0 : index
      %c0_9 = arith.constant 0 : index
      %c0_10 = arith.constant 0 : index
      %16 = vector.load %arg3[%c0_8, %c0_9, %c0_10] : memref<9x4x8xf32, #tpu.memory_space<vmem>>, vector<1x4x8xf32>
      %17 = vector.shape_cast %16 : vector<1x4x8xf32> to vector<4x8xf32>
      %cst_11 = arith.constant dense<0.000000e+00> : vector<64x8xf32>
      %18 = tpu.matmul %15, %17, %cst_11 {dimension_numbers = #tpu.dot_dimension_numbers<[1], [0], [0], [1], [0, 0, 1, 1], [], []>} : vector<64x4xf32>, vector<4x8xf32>, vector<64x8xf32> -> vector<64x8xf32>
      %19 = arith.addf %12, %18 : vector<64x8xf32>
      %c0_12 = arith.constant 0 : index
      %c9 = arith.constant 9 : index
      %c0_13 = arith.constant 0 : index
      %c0_14 = arith.constant 0 : index
      %20 = vector.load %arg2[%c0_12, %c9, %c0_13, %c0_14] : memref<1x36x9x4xf32, #tpu.memory_space<vmem>>, vector<1x8x8x4xf32>
      %21 = vector.shape_cast %20 : vector<1x8x8x4xf32> to vector<8x8x4xf32>
      %22 = vector.shape_cast %21 : vector<8x8x4xf32> to vector<64x4xf32>
      %c1 = arith.constant 1 : index
      %c0_15 = arith.constant 0 : index
      %c0_16 = arith.constant 0 : index
      %23 = vector.load %arg3[%c1, %c0_15, %c0_16] : memref<9x4x8xf32, #tpu.memory_space<vmem>>, vector<1x4x8xf32>
      %24 = vector.shape_cast %23 : vector<1x4x8xf32> to vector<4x8xf32>
      %cst_17 = arith.constant dense<0.000000e+00> : vector<64x8xf32>
      %25 = tpu.matmul %22, %24, %cst_17 {dimension_numbers = #tpu.dot_dimension_numbers<[1], [0], [0], [1], [0, 0, 1, 1], [], []>} : vector<64x4xf32>, vector<4x8xf32>, vector<64x8xf32> -> vector<64x8xf32>
      %26 = arith.addf %19, %25 : vector<64x8xf32>
      %c0_18 = arith.constant 0 : index
      %c0_19 = arith.constant 0 : index
      %c1_20 = arith.constant 1 : index
      %c0_21 = arith.constant 0 : index
      %27 = vector.load %arg2[%c0_18, %c0_19, %c1_20, %c0_21] : memref<1x36x9x4xf32, #tpu.memory_space<vmem>>, vector<1x8x8x4xf32>
      %28 = vector.shape_cast %27 : vector<1x8x8x4xf32> to vector<8x8x4xf32>
      %29 = vector.shape_cast %28 : vector<8x8x4xf32> to vector<64x4xf32>
      %c2 = arith.constant 2 : index
      %c0_22 = arith.constant 0 : index
      %c0_23 = arith.constant 0 : index
      %30 = vector.load %arg3[%c2, %c0_22, %c0_23] : memref<9x4x8xf32, #tpu.memory_space<vmem>>, vector<1x4x8xf32>
      %31 = vector.shape_cast %30 : vector<1x4x8xf32> to vector<4x8xf32>
      %cst_24 = arith.constant dense<0.000000e+00> : vector<64x8xf32>
      %32 = tpu.matmul %29, %31, %cst_24 {dimension_numbers = #tpu.dot_dimension_numbers<[1], [0], [0], [1], [0, 0, 1, 1], [], []>} : vector<64x4xf32>, vector<4x8xf32>, vector<64x8xf32> -> vector<64x8xf32>
      %33 = arith.addf %26, %32 : vector<64x8xf32>
      %c0_25 = arith.constant 0 : index
      %c18 = arith.constant 18 : index
      %c0_26 = arith.constant 0 : index
      %c0_27 = arith.constant 0 : index
      %34 = vector.load %arg2[%c0_25, %c18, %c0_26, %c0_27] : memref<1x36x9x4xf32, #tpu.memory_space<vmem>>, vector<1x8x8x4xf32>
      %35 = vector.shape_cast %34 : vector<1x8x8x4xf32> to vector<8x8x4xf32>
      %36 = vector.shape_cast %35 : vector<8x8x4xf32> to vector<64x4xf32>
      %c3 = arith.constant 3 : index
      %c0_28 = arith.constant 0 : index
      %c0_29 = arith.constant 0 : index
      %37 = vector.load %arg3[%c3, %c0_28, %c0_29] : memref<9x4x8xf32, #tpu.memory_space<vmem>>, vector<1x4x8xf32>
      %38 = vector.shape_cast %37 : vector<1x4x8xf32> to vector<4x8xf32>
      %cst_30 = arith.constant dense<0.000000e+00> : vector<64x8xf32>
      %39 = tpu.matmul %36, %38, %cst_30 {dimension_numbers = #tpu.dot_dimension_numbers<[1], [0], [0], [1], [0, 0, 1, 1], [], []>} : vector<64x4xf32>, vector<4x8xf32>, vector<64x8xf32> -> vector<64x8xf32>
      %40 = arith.addf %33, %39 : vector<64x8xf32>
      %c0_31 = arith.constant 0 : index
      %c27 = arith.constant 27 : index
      %c0_32 = arith.constant 0 : index
      %c0_33 = arith.constant 0 : index
      %41 = vector.load %arg2[%c0_31, %c27, %c0_32, %c0_33] : memref<1x36x9x4xf32, #tpu.memory_space<vmem>>, vector<1x8x8x4xf32>
      %42 = vector.shape_cast %41 : vector<1x8x8x4xf32> to vector<8x8x4xf32>
      %43 = vector.shape_cast %42 : vector<8x8x4xf32> to vector<64x4xf32>
      %c4 = arith.constant 4 : index
      %c0_34 = arith.constant 0 : index
      %c0_35 = arith.constant 0 : index
      %44 = vector.load %arg3[%c4, %c0_34, %c0_35] : memref<9x4x8xf32, #tpu.memory_space<vmem>>, vector<1x4x8xf32>
      %45 = vector.shape_cast %44 : vector<1x4x8xf32> to vector<4x8xf32>
      %cst_36 = arith.constant dense<0.000000e+00> : vector<64x8xf32>
      %46 = tpu.matmul %43, %45, %cst_36 {dimension_numbers = #tpu.dot_dimension_numbers<[1], [0], [0], [1], [0, 0, 1, 1], [], []>} : vector<64x4xf32>, vector<4x8xf32>, vector<64x8xf32> -> vector<64x8xf32>
      %47 = arith.addf %40, %46 : vector<64x8xf32>
      %c0_37 = arith.constant 0 : index
      %c18_38 = arith.constant 18 : index
      %c1_39 = arith.constant 1 : index
      %c0_40 = arith.constant 0 : index
      %48 = vector.load %arg2[%c0_37, %c18_38, %c1_39, %c0_40] : memref<1x36x9x4xf32, #tpu.memory_space<vmem>>, vector<1x8x8x4xf32>
      %49 = vector.shape_cast %48 : vector<1x8x8x4xf32> to vector<8x8x4xf32>
      %50 = vector.shape_cast %49 : vector<8x8x4xf32> to vector<64x4xf32>
      %c5 = arith.constant 5 : index
      %c0_41 = arith.constant 0 : index
      %c0_42 = arith.constant 0 : index
      %51 = vector.load %arg3[%c5, %c0_41, %c0_42] : memref<9x4x8xf32, #tpu.memory_space<vmem>>, vector<1x4x8xf32>
      %52 = vector.shape_cast %51 : vector<1x4x8xf32> to vector<4x8xf32>
      %cst_43 = arith.constant dense<0.000000e+00> : vector<64x8xf32>
      %53 = tpu.matmul %50, %52, %cst_43 {dimension_numbers = #tpu.dot_dimension_numbers<[1], [0], [0], [1], [0, 0, 1, 1], [], []>} : vector<64x4xf32>, vector<4x8xf32>, vector<64x8xf32> -> vector<64x8xf32>
      %54 = arith.addf %47, %53 : vector<64x8xf32>
      %c0_44 = arith.constant 0 : index
      %c1_45 = arith.constant 1 : index
      %c0_46 = arith.constant 0 : index
      %c0_47 = arith.constant 0 : index
      %55 = vector.load %arg2[%c0_44, %c1_45, %c0_46, %c0_47] : memref<1x36x9x4xf32, #tpu.memory_space<vmem>>, vector<1x8x8x4xf32>
      %56 = vector.shape_cast %55 : vector<1x8x8x4xf32> to vector<8x8x4xf32>
      %57 = vector.shape_cast %56 : vector<8x8x4xf32> to vector<64x4xf32>
      %c6 = arith.constant 6 : index
      %c0_48 = arith.constant 0 : index
      %c0_49 = arith.constant 0 : index
      %58 = vector.load %arg3[%c6, %c0_48, %c0_49] : memref<9x4x8xf32, #tpu.memory_space<vmem>>, vector<1x4x8xf32>
      %59 = vector.shape_cast %58 : vector<1x4x8xf32> to vector<4x8xf32>
      %cst_50 = arith.constant dense<0.000000e+00> : vector<64x8xf32>
      %60 = tpu.matmul %57, %59, %cst_50 {dimension_numbers = #tpu.dot_dimension_numbers<[1], [0], [0], [1], [0, 0, 1, 1], [], []>} : vector<64x4xf32>, vector<4x8xf32>, vector<64x8xf32> -> vector<64x8xf32>
      %61 = arith.addf %54, %60 : vector<64x8xf32>
      %c0_51 = arith.constant 0 : index
      %c10 = arith.constant 10 : index
      %c0_52 = arith.constant 0 : index
      %c0_53 = arith.constant 0 : index
      %62 = vector.load %arg2[%c0_51, %c10, %c0_52, %c0_53] : memref<1x36x9x4xf32, #tpu.memory_space<vmem>>, vector<1x8x8x4xf32>
      %63 = vector.shape_cast %62 : vector<1x8x8x4xf32> to vector<8x8x4xf32>
      %64 = vector.shape_cast %63 : vector<8x8x4xf32> to vector<64x4xf32>
      %c7 = arith.constant 7 : index
      %c0_54 = arith.constant 0 : index
      %c0_55 = arith.constant 0 : index
      %65 = vector.load %arg3[%c7, %c0_54, %c0_55] : memref<9x4x8xf32, #tpu.memory_space<vmem>>, vector<1x4x8xf32>
      %66 = vector.shape_cast %65 : vector<1x4x8xf32> to vector<4x8xf32>
      %cst_56 = arith.constant dense<0.000000e+00> : vector<64x8xf32>
      %67 = tpu.matmul %64, %66, %cst_56 {dimension_numbers = #tpu.dot_dimension_numbers<[1], [0], [0], [1], [0, 0, 1, 1], [], []>} : vector<64x4xf32>, vector<4x8xf32>, vector<64x8xf32> -> vector<64x8xf32>
      %68 = arith.addf %61, %67 : vector<64x8xf32>
      %c0_57 = arith.constant 0 : index
      %c1_58 = arith.constant 1 : index
      %c1_59 = arith.constant 1 : index
      %c0_60 = arith.constant 0 : index
      %69 = vector.load %arg2[%c0_57, %c1_58, %c1_59, %c0_60] : memref<1x36x9x4xf32, #tpu.memory_space<vmem>>, vector<1x8x8x4xf32>
      %70 = vector.shape_cast %69 : vector<1x8x8x4xf32> to vector<8x8x4xf32>
      %71 = vector.shape_cast %70 : vector<8x8x4xf32> to vector<64x4xf32>
      %c8 = arith.constant 8 : index
      %c0_61 = arith.constant 0 : index
      %c0_62 = arith.constant 0 : index
      %72 = vector.load %arg3[%c8, %c0_61, %c0_62] : memref<9x4x8xf32, #tpu.memory_space<vmem>>, vector<1x4x8xf32>
      %73 = vector.shape_cast %72 : vector<1x4x8xf32> to vector<4x8xf32>
      %cst_63 = arith.constant dense<0.000000e+00> : vector<64x8xf32>
      %74 = tpu.matmul %71, %73, %cst_63 {dimension_numbers = #tpu.dot_dimension_numbers<[1], [0], [0], [1], [0, 0, 1, 1], [], []>} : vector<64x4xf32>, vector<4x8xf32>, vector<64x8xf32> -> vector<64x8xf32>
      %75 = arith.addf %68, %74 : vector<64x8xf32>
      %76 = arith.index_cast %arg1 : i32 to index
      %c0_64 = arith.constant 0 : index
      %c0_65 = arith.constant 0 : index
      %77 = vector.load %arg7[%76, %c0_64, %c0_65] : memref<2x64x8xf32, #tpu.memory_space<vmem>>, vector<1x64x8xf32>
      %78 = vector.shape_cast %77 : vector<1x64x8xf32> to vector<64x8xf32>
      %79 = vector.shape_cast %75 : vector<64x8xf32> to vector<1x64x8xf32>
      tpu.vector_store %arg7[%76, %c0_64, %c0_65], %79 {strides = array<i32>} : memref<2x64x8xf32, #tpu.memory_space<vmem>>, vector<1x64x8xf32>,
      %c0_66 = arith.constant 0 : index
      %c0_67 = arith.constant 0 : index
      %80 = vector.load %arg9[%c0_66, %c0_67] : memref<8x8xf32, #tpu.memory_space<vmem>>, vector<1x8xf32>
      %cst_68 = arith.constant dense<0.000000e+00> : vector<8xf32>
      %81 = vector.multi_reduction <add>, %75, %cst_68 [0] : vector<64x8xf32> to vector<8xf32>
      %82 = vector.shape_cast %81 : vector<8xf32> to vector<1x8xf32>
      %83 = arith.addf %80, %82 : vector<1x8xf32>
      %c0_69 = arith.constant 0 : index
      %c0_70 = arith.constant 0 : index
      %84 = vector.load %arg9[%c0_69, %c0_70] : memref<8x8xf32, #tpu.memory_space<vmem>>, vector<1x8xf32>
      tpu.vector_store %arg9[%c0_69, %c0_70], %83 {strides = array<i32>} : memref<8x8xf32, #tpu.memory_space<vmem>>, vector<1x8xf32>,
      %c1_71 = arith.constant 1 : index
      %c0_72 = arith.constant 0 : index
      %85 = vector.load %arg9[%c1_71, %c0_72] : memref<8x8xf32, #tpu.memory_space<vmem>>, vector<1x8xf32>
      %86 = arith.mulf %75, %75 : vector<64x8xf32>
      %cst_73 = arith.constant dense<0.000000e+00> : vector<8xf32>
      %87 = vector.multi_reduction <add>, %86, %cst_73 [0] : vector<64x8xf32> to vector<8xf32>
      %88 = vector.shape_cast %87 : vector<8xf32> to vector<1x8xf32>
      %89 = arith.addf %85, %88 : vector<1x8xf32>
      %c1_74 = arith.constant 1 : index
      %c0_75 = arith.constant 0 : index
      %90 = vector.load %arg9[%c1_74, %c0_75] : memref<8x8xf32, #tpu.memory_space<vmem>>, vector<1x8xf32>
      tpu.vector_store %arg9[%c1_74, %c0_75], %89 {strides = array<i32>} : memref<8x8xf32, #tpu.memory_space<vmem>>, vector<1x8xf32>,
    } else {
    }
    %c1_i32 = arith.constant 1 : i32
    %3 = arith.cmpi eq, %arg0, %c1_i32 : i32
    %4 = arith.extui %3 : i1 to i32
    %c0_i32_1 = arith.constant 0 : i32
    %5 = arith.cmpi ne, %4, %c0_i32_1 : i32
    scf.if %5 {
      %c0_i32_3 = arith.constant 0 : i32
      %9 = arith.cmpi eq, %arg1, %c0_i32_3 : i32
      %10 = arith.extui %9 : i1 to i32
      %c0_i32_4 = arith.constant 0 : i32
      %11 = arith.cmpi ne, %10, %c0_i32_4 : i32
      scf.if %11 {
        %c0_80 = arith.constant 0 : index
        %c0_81 = arith.constant 0 : index
        %95 = vector.load %arg9[%c0_80, %c0_81] : memref<8x8xf32, #tpu.memory_space<vmem>>, vector<1x8xf32>
        %cst_82 = arith.constant 7.812500e-03 : f32
        %96 = vector.broadcast %cst_82 : f32 to vector<1x8xf32>
        %97 = arith.mulf %95, %96 : vector<1x8xf32>
        %c1_83 = arith.constant 1 : index
        %c0_84 = arith.constant 0 : index
        %98 = vector.load %arg9[%c1_83, %c0_84] : memref<8x8xf32, #tpu.memory_space<vmem>>, vector<1x8xf32>
        %cst_85 = arith.constant 7.812500e-03 : f32
        %99 = vector.broadcast %cst_85 : f32 to vector<1x8xf32>
        %100 = arith.mulf %98, %99 : vector<1x8xf32>
        %101 = arith.mulf %97, %97 : vector<1x8xf32>
        %102 = arith.subf %100, %101 : vector<1x8xf32>
        %c0_86 = arith.constant 0 : index
        %c0_87 = arith.constant 0 : index
        %103 = vector.load %arg5[%c0_86, %c0_87] : memref<4x8xf32, #tpu.memory_space<vmem>>, vector<1x8xf32>
        %cst_88 = arith.constant 9.99999974E-6 : f32
        %104 = vector.broadcast %cst_88 : f32 to vector<1x8xf32>
        %105 = arith.addf %102, %104 : vector<1x8xf32>
        %106 = math.rsqrt %105 : vector<1x8xf32>
        %107 = arith.mulf %103, %106 : vector<1x8xf32>
        %c4_89 = arith.constant 4 : index
        %c0_90 = arith.constant 0 : index
        %108 = vector.load %arg9[%c4_89, %c0_90] : memref<8x8xf32, #tpu.memory_space<vmem>>, vector<1x8xf32>
        tpu.vector_store %arg9[%c4_89, %c0_90], %107 {strides = array<i32>} : memref<8x8xf32, #tpu.memory_space<vmem>>, vector<1x8xf32>,
        %c1_91 = arith.constant 1 : index
        %c0_92 = arith.constant 0 : index
        %109 = vector.load %arg5[%c1_91, %c0_92] : memref<4x8xf32, #tpu.memory_space<vmem>>, vector<1x8xf32>
        %110 = arith.mulf %97, %107 : vector<1x8xf32>
        %111 = arith.subf %109, %110 : vector<1x8xf32>
        %c5_93 = arith.constant 5 : index
        %c0_94 = arith.constant 0 : index
        %112 = vector.load %arg9[%c5_93, %c0_94] : memref<8x8xf32, #tpu.memory_space<vmem>>, vector<1x8xf32>
        tpu.vector_store %arg9[%c5_93, %c0_94], %111 {strides = array<i32>} : memref<8x8xf32, #tpu.memory_space<vmem>>, vector<1x8xf32>,
        %cst_95 = arith.constant 0.000000e+00 : f32
        %113 = vector.broadcast %cst_95 : f32 to vector<1x8xf32>
        %c2_96 = arith.constant 2 : index
        %c0_97 = arith.constant 0 : index
        %114 = vector.load %arg9[%c2_96, %c0_97] : memref<8x8xf32, #tpu.memory_space<vmem>>, vector<1x8xf32>
        tpu.vector_store %arg9[%c2_96, %c0_97], %113 {strides = array<i32>} : memref<8x8xf32, #tpu.memory_space<vmem>>, vector<1x8xf32>,
        %cst_98 = arith.constant 0.000000e+00 : f32
        %115 = vector.broadcast %cst_98 : f32 to vector<1x8xf32>
        %c3_99 = arith.constant 3 : index
        %c0_100 = arith.constant 0 : index
        %116 = vector.load %arg9[%c3_99, %c0_100] : memref<8x8xf32, #tpu.memory_space<vmem>>, vector<1x8xf32>
        tpu.vector_store %arg9[%c3_99, %c0_100], %115 {strides = array<i32>} : memref<8x8xf32, #tpu.memory_space<vmem>>, vector<1x8xf32>,
        %cst_101 = arith.constant 0.000000e+00 : f32
        %117 = vector.broadcast %cst_101 : f32 to vector<10x24x8xf32>
        %c0_102 = arith.constant 0 : index
        %c0_103 = arith.constant 0 : index
        %c0_104 = arith.constant 0 : index
        %118 = vector.load %arg10[%c0_102, %c0_103, %c0_104] : memref<10x24x8xf32, #tpu.memory_space<vmem>>, vector<10x24x8xf32>
        tpu.vector_store %arg10[%c0_102, %c0_103, %c0_104], %117 {strides = array<i32>} : memref<10x24x8xf32, #tpu.memory_space<vmem>>, vector<10x24x8xf32>,
      } else {
      }
      %12 = arith.index_cast %arg1 : i32 to index
      %c0 = arith.constant 0 : index
      %c0_5 = arith.constant 0 : index
      %13 = vector.load %arg7[%12, %c0, %c0_5] : memref<2x64x8xf32, #tpu.memory_space<vmem>>, vector<1x64x8xf32>
      %14 = vector.shape_cast %13 : vector<1x64x8xf32> to vector<64x8xf32>
      %c4 = arith.constant 4 : index
      %c0_6 = arith.constant 0 : index
      %15 = vector.load %arg9[%c4, %c0_6] : memref<8x8xf32, #tpu.memory_space<vmem>>, vector<1x8xf32>
      %16 = vector.broadcast %15 : vector<1x8xf32> to vector<64x8xf32>
      %17 = arith.mulf %14, %16 : vector<64x8xf32>
      %c5 = arith.constant 5 : index
      %c0_7 = arith.constant 0 : index
      %18 = vector.load %arg9[%c5, %c0_7] : memref<8x8xf32, #tpu.memory_space<vmem>>, vector<1x8xf32>
      %19 = vector.broadcast %18 : vector<1x8xf32> to vector<64x8xf32>
      %20 = arith.addf %17, %19 : vector<64x8xf32>
      %cst = arith.constant 0.000000e+00 : f32
      %21 = vector.broadcast %cst : f32 to vector<64x8xf32>
      %22 = arith.maximumf %20, %21 : vector<64x8xf32>
      %23 = vector.shape_cast %22 : vector<64x8xf32> to vector<8x8x8xf32>
      %c1 = arith.constant 1 : index
      %c8 = arith.constant 8 : index
      %c0_8 = arith.constant 0 : index
      %24 = vector.load %arg10[%c1, %c8, %c0_8] : memref<10x24x8xf32, #tpu.memory_space<vmem>>, vector<8x8x8xf32>
      tpu.vector_store %arg10[%c1, %c8, %c0_8], %23 {strides = array<i32>} : memref<10x24x8xf32, #tpu.memory_space<vmem>>, vector<8x8x8xf32>,
      %cst_9 = arith.constant 0.000000e+00 : f32
      %25 = vector.broadcast %cst_9 : f32 to vector<64x8xf32>
      %c0_10 = arith.constant 0 : index
      %c7 = arith.constant 7 : index
      %c0_11 = arith.constant 0 : index
      %26 = vector.load %arg10[%c0_10, %c7, %c0_11] : memref<10x24x8xf32, #tpu.memory_space<vmem>>, vector<8x8x8xf32>
      %27 = vector.shape_cast %26 : vector<8x8x8xf32> to vector<64x8xf32>
      %c0_12 = arith.constant 0 : index
      %c0_13 = arith.constant 0 : index
      %c0_14 = arith.constant 0 : index
      %28 = vector.load %arg4[%c0_12, %c0_13, %c0_14] : memref<9x8x8xf32, #tpu.memory_space<vmem>>, vector<1x8x8xf32>
      %29 = vector.shape_cast %28 : vector<1x8x8xf32> to vector<8x8xf32>
      %cst_15 = arith.constant dense<0.000000e+00> : vector<64x8xf32>
      %30 = tpu.matmul %27, %29, %cst_15 {dimension_numbers = #tpu.dot_dimension_numbers<[1], [0], [0], [1], [0, 0, 1, 1], [], []>} : vector<64x8xf32>, vector<8x8xf32>, vector<64x8xf32> -> vector<64x8xf32>
      %31 = arith.addf %25, %30 : vector<64x8xf32>
      %c0_16 = arith.constant 0 : index
      %c8_17 = arith.constant 8 : index
      %c0_18 = arith.constant 0 : index
      %32 = vector.load %arg10[%c0_16, %c8_17, %c0_18] : memref<10x24x8xf32, #tpu.memory_space<vmem>>, vector<8x8x8xf32>
      %33 = vector.shape_cast %32 : vector<8x8x8xf32> to vector<64x8xf32>
      %c1_19 = arith.constant 1 : index
      %c0_20 = arith.constant 0 : index
      %c0_21 = arith.constant 0 : index
      %34 = vector.load %arg4[%c1_19, %c0_20, %c0_21] : memref<9x8x8xf32, #tpu.memory_space<vmem>>, vector<1x8x8xf32>
      %35 = vector.shape_cast %34 : vector<1x8x8xf32> to vector<8x8xf32>
      %cst_22 = arith.constant dense<0.000000e+00> : vector<64x8xf32>
      %36 = tpu.matmul %33, %35, %cst_22 {dimension_numbers = #tpu.dot_dimension_numbers<[1], [0], [0], [1], [0, 0, 1, 1], [], []>} : vector<64x8xf32>, vector<8x8xf32>, vector<64x8xf32> -> vector<64x8xf32>
      %37 = arith.addf %31, %36 : vector<64x8xf32>
      %c0_23 = arith.constant 0 : index
      %c9 = arith.constant 9 : index
      %c0_24 = arith.constant 0 : index
      %38 = vector.load %arg10[%c0_23, %c9, %c0_24] : memref<10x24x8xf32, #tpu.memory_space<vmem>>, vector<8x8x8xf32>
      %39 = vector.shape_cast %38 : vector<8x8x8xf32> to vector<64x8xf32>
      %c2 = arith.constant 2 : index
      %c0_25 = arith.constant 0 : index
      %c0_26 = arith.constant 0 : index
      %40 = vector.load %arg4[%c2, %c0_25, %c0_26] : memref<9x8x8xf32, #tpu.memory_space<vmem>>, vector<1x8x8xf32>
      %41 = vector.shape_cast %40 : vector<1x8x8xf32> to vector<8x8xf32>
      %cst_27 = arith.constant dense<0.000000e+00> : vector<64x8xf32>
      %42 = tpu.matmul %39, %41, %cst_27 {dimension_numbers = #tpu.dot_dimension_numbers<[1], [0], [0], [1], [0, 0, 1, 1], [], []>} : vector<64x8xf32>, vector<8x8xf32>, vector<64x8xf32> -> vector<64x8xf32>
      %43 = arith.addf %37, %42 : vector<64x8xf32>
      %c1_28 = arith.constant 1 : index
      %c7_29 = arith.constant 7 : index
      %c0_30 = arith.constant 0 : index
      %44 = vector.load %arg10[%c1_28, %c7_29, %c0_30] : memref<10x24x8xf32, #tpu.memory_space<vmem>>, vector<8x8x8xf32>
      %45 = vector.shape_cast %44 : vector<8x8x8xf32> to vector<64x8xf32>
      %c3 = arith.constant 3 : index
      %c0_31 = arith.constant 0 : index
      %c0_32 = arith.constant 0 : index
      %46 = vector.load %arg4[%c3, %c0_31, %c0_32] : memref<9x8x8xf32, #tpu.memory_space<vmem>>, vector<1x8x8xf32>
      %47 = vector.shape_cast %46 : vector<1x8x8xf32> to vector<8x8xf32>
      %cst_33 = arith.constant dense<0.000000e+00> : vector<64x8xf32>
      %48 = tpu.matmul %45, %47, %cst_33 {dimension_numbers = #tpu.dot_dimension_numbers<[1], [0], [0], [1], [0, 0, 1, 1], [], []>} : vector<64x8xf32>, vector<8x8xf32>, vector<64x8xf32> -> vector<64x8xf32>
      %49 = arith.addf %43, %48 : vector<64x8xf32>
      %c1_34 = arith.constant 1 : index
      %c8_35 = arith.constant 8 : index
      %c0_36 = arith.constant 0 : index
      %50 = vector.load %arg10[%c1_34, %c8_35, %c0_36] : memref<10x24x8xf32, #tpu.memory_space<vmem>>, vector<8x8x8xf32>
      %51 = vector.shape_cast %50 : vector<8x8x8xf32> to vector<64x8xf32>
      %c4_37 = arith.constant 4 : index
      %c0_38 = arith.constant 0 : index
      %c0_39 = arith.constant 0 : index
      %52 = vector.load %arg4[%c4_37, %c0_38, %c0_39] : memref<9x8x8xf32, #tpu.memory_space<vmem>>, vector<1x8x8xf32>
      %53 = vector.shape_cast %52 : vector<1x8x8xf32> to vector<8x8xf32>
      %cst_40 = arith.constant dense<0.000000e+00> : vector<64x8xf32>
      %54 = tpu.matmul %51, %53, %cst_40 {dimension_numbers = #tpu.dot_dimension_numbers<[1], [0], [0], [1], [0, 0, 1, 1], [], []>} : vector<64x8xf32>, vector<8x8xf32>, vector<64x8xf32> -> vector<64x8xf32>
      %55 = arith.addf %49, %54 : vector<64x8xf32>
      %c1_41 = arith.constant 1 : index
      %c9_42 = arith.constant 9 : index
      %c0_43 = arith.constant 0 : index
      %56 = vector.load %arg10[%c1_41, %c9_42, %c0_43] : memref<10x24x8xf32, #tpu.memory_space<vmem>>, vector<8x8x8xf32>
      %57 = vector.shape_cast %56 : vector<8x8x8xf32> to vector<64x8xf32>
      %c5_44 = arith.constant 5 : index
      %c0_45 = arith.constant 0 : index
      %c0_46 = arith.constant 0 : index
      %58 = vector.load %arg4[%c5_44, %c0_45, %c0_46] : memref<9x8x8xf32, #tpu.memory_space<vmem>>, vector<1x8x8xf32>
      %59 = vector.shape_cast %58 : vector<1x8x8xf32> to vector<8x8xf32>
      %cst_47 = arith.constant dense<0.000000e+00> : vector<64x8xf32>
      %60 = tpu.matmul %57, %59, %cst_47 {dimension_numbers = #tpu.dot_dimension_numbers<[1], [0], [0], [1], [0, 0, 1, 1], [], []>} : vector<64x8xf32>, vector<8x8xf32>, vector<64x8xf32> -> vector<64x8xf32>
      %61 = arith.addf %55, %60 : vector<64x8xf32>
      %c2_48 = arith.constant 2 : index
      %c7_49 = arith.constant 7 : index
      %c0_50 = arith.constant 0 : index
      %62 = vector.load %arg10[%c2_48, %c7_49, %c0_50] : memref<10x24x8xf32, #tpu.memory_space<vmem>>, vector<8x8x8xf32>
      %63 = vector.shape_cast %62 : vector<8x8x8xf32> to vector<64x8xf32>
      %c6 = arith.constant 6 : index
      %c0_51 = arith.constant 0 : index
      %c0_52 = arith.constant 0 : index
      %64 = vector.load %arg4[%c6, %c0_51, %c0_52] : memref<9x8x8xf32, #tpu.memory_space<vmem>>, vector<1x8x8xf32>
      %65 = vector.shape_cast %64 : vector<1x8x8xf32> to vector<8x8xf32>
      %cst_53 = arith.constant dense<0.000000e+00> : vector<64x8xf32>
      %66 = tpu.matmul %63, %65, %cst_53 {dimension_numbers = #tpu.dot_dimension_numbers<[1], [0], [0], [1], [0, 0, 1, 1], [], []>} : vector<64x8xf32>, vector<8x8xf32>, vector<64x8xf32> -> vector<64x8xf32>
      %67 = arith.addf %61, %66 : vector<64x8xf32>
      %c2_54 = arith.constant 2 : index
      %c8_55 = arith.constant 8 : index
      %c0_56 = arith.constant 0 : index
      %68 = vector.load %arg10[%c2_54, %c8_55, %c0_56] : memref<10x24x8xf32, #tpu.memory_space<vmem>>, vector<8x8x8xf32>
      %69 = vector.shape_cast %68 : vector<8x8x8xf32> to vector<64x8xf32>
      %c7_57 = arith.constant 7 : index
      %c0_58 = arith.constant 0 : index
      %c0_59 = arith.constant 0 : index
      %70 = vector.load %arg4[%c7_57, %c0_58, %c0_59] : memref<9x8x8xf32, #tpu.memory_space<vmem>>, vector<1x8x8xf32>
      %71 = vector.shape_cast %70 : vector<1x8x8xf32> to vector<8x8xf32>
      %cst_60 = arith.constant dense<0.000000e+00> : vector<64x8xf32>
      %72 = tpu.matmul %69, %71, %cst_60 {dimension_numbers = #tpu.dot_dimension_numbers<[1], [0], [0], [1], [0, 0, 1, 1], [], []>} : vector<64x8xf32>, vector<8x8xf32>, vector<64x8xf32> -> vector<64x8xf32>
      %73 = arith.addf %67, %72 : vector<64x8xf32>
      %c2_61 = arith.constant 2 : index
      %c9_62 = arith.constant 9 : index
      %c0_63 = arith.constant 0 : index
      %74 = vector.load %arg10[%c2_61, %c9_62, %c0_63] : memref<10x24x8xf32, #tpu.memory_space<vmem>>, vector<8x8x8xf32>
      %75 = vector.shape_cast %74 : vector<8x8x8xf32> to vector<64x8xf32>
      %c8_64 = arith.constant 8 : index
      %c0_65 = arith.constant 0 : index
      %c0_66 = arith.constant 0 : index
      %76 = vector.load %arg4[%c8_64, %c0_65, %c0_66] : memref<9x8x8xf32, #tpu.memory_space<vmem>>, vector<1x8x8xf32>
      %77 = vector.shape_cast %76 : vector<1x8x8xf32> to vector<8x8xf32>
      %cst_67 = arith.constant dense<0.000000e+00> : vector<64x8xf32>
      %78 = tpu.matmul %75, %77, %cst_67 {dimension_numbers = #tpu.dot_dimension_numbers<[1], [0], [0], [1], [0, 0, 1, 1], [], []>} : vector<64x8xf32>, vector<8x8xf32>, vector<64x8xf32> -> vector<64x8xf32>
      %79 = arith.addf %73, %78 : vector<64x8xf32>
      %80 = arith.index_cast %arg1 : i32 to index
      %c0_68 = arith.constant 0 : index
      %c0_69 = arith.constant 0 : index
      %81 = vector.load %arg8[%80, %c0_68, %c0_69] : memref<2x64x8xf32, #tpu.memory_space<vmem>>, vector<1x64x8xf32>
      %82 = vector.shape_cast %81 : vector<1x64x8xf32> to vector<64x8xf32>
      %83 = vector.shape_cast %79 : vector<64x8xf32> to vector<1x64x8xf32>
      tpu.vector_store %arg8[%80, %c0_68, %c0_69], %83 {strides = array<i32>} : memref<2x64x8xf32, #tpu.memory_space<vmem>>, vector<1x64x8xf32>,
      %c2_70 = arith.constant 2 : index
      %c0_71 = arith.constant 0 : index
      %84 = vector.load %arg9[%c2_70, %c0_71] : memref<8x8xf32, #tpu.memory_space<vmem>>, vector<1x8xf32>
      %cst_72 = arith.constant dense<0.000000e+00> : vector<8xf32>
      %85 = vector.multi_reduction <add>, %79, %cst_72 [0] : vector<64x8xf32> to vector<8xf32>
      %86 = vector.shape_cast %85 : vector<8xf32> to vector<1x8xf32>
      %87 = arith.addf %84, %86 : vector<1x8xf32>
      %c2_73 = arith.constant 2 : index
      %c0_74 = arith.constant 0 : index
      %88 = vector.load %arg9[%c2_73, %c0_74] : memref<8x8xf32, #tpu.memory_space<vmem>>, vector<1x8xf32>
      tpu.vector_store %arg9[%c2_73, %c0_74], %87 {strides = array<i32>} : memref<8x8xf32, #tpu.memory_space<vmem>>, vector<1x8xf32>,
      %c3_75 = arith.constant 3 : index
      %c0_76 = arith.constant 0 : index
      %89 = vector.load %arg9[%c3_75, %c0_76] : memref<8x8xf32, #tpu.memory_space<vmem>>, vector<1x8xf32>
      %90 = arith.mulf %79, %79 : vector<64x8xf32>
      %cst_77 = arith.constant dense<0.000000e+00> : vector<8xf32>
      %91 = vector.multi_reduction <add>, %90, %cst_77 [0] : vector<64x8xf32> to vector<8xf32>
      %92 = vector.shape_cast %91 : vector<8xf32> to vector<1x8xf32>
      %93 = arith.addf %89, %92 : vector<1x8xf32>
      %c3_78 = arith.constant 3 : index
      %c0_79 = arith.constant 0 : index
      %94 = vector.load %arg9[%c3_78, %c0_79] : memref<8x8xf32, #tpu.memory_space<vmem>>, vector<1x8xf32>
      tpu.vector_store %arg9[%c3_78, %c0_79], %93 {strides = array<i32>} : memref<8x8xf32, #tpu.memory_space<vmem>>, vector<1x8xf32>,
    } else {
    }
    %c2_i32 = arith.constant 2 : i32
    %6 = arith.cmpi eq, %arg0, %c2_i32 : i32
    %7 = arith.extui %6 : i1 to i32
    %c0_i32_2 = arith.constant 0 : i32
    %8 = arith.cmpi ne, %7, %c0_i32_2 : i32
    scf.if %8 {
      %c0_i32_3 = arith.constant 0 : i32
      %9 = arith.cmpi eq, %arg1, %c0_i32_3 : i32
      %10 = arith.extui %9 : i1 to i32
      %c0_i32_4 = arith.constant 0 : i32
      %11 = arith.cmpi ne, %10, %c0_i32_4 : i32
      scf.if %11 {
        %c2 = arith.constant 2 : index
        %c0_17 = arith.constant 0 : index
        %39 = vector.load %arg9[%c2, %c0_17] : memref<8x8xf32, #tpu.memory_space<vmem>>, vector<1x8xf32>
        %cst_18 = arith.constant 7.812500e-03 : f32
        %40 = vector.broadcast %cst_18 : f32 to vector<1x8xf32>
        %41 = arith.mulf %39, %40 : vector<1x8xf32>
        %c3 = arith.constant 3 : index
        %c0_19 = arith.constant 0 : index
        %42 = vector.load %arg9[%c3, %c0_19] : memref<8x8xf32, #tpu.memory_space<vmem>>, vector<1x8xf32>
        %cst_20 = arith.constant 7.812500e-03 : f32
        %43 = vector.broadcast %cst_20 : f32 to vector<1x8xf32>
        %44 = arith.mulf %42, %43 : vector<1x8xf32>
        %45 = arith.mulf %41, %41 : vector<1x8xf32>
        %46 = arith.subf %44, %45 : vector<1x8xf32>
        %c2_21 = arith.constant 2 : index
        %c0_22 = arith.constant 0 : index
        %47 = vector.load %arg5[%c2_21, %c0_22] : memref<4x8xf32, #tpu.memory_space<vmem>>, vector<1x8xf32>
        %cst_23 = arith.constant 9.99999974E-6 : f32
        %48 = vector.broadcast %cst_23 : f32 to vector<1x8xf32>
        %49 = arith.addf %46, %48 : vector<1x8xf32>
        %50 = math.rsqrt %49 : vector<1x8xf32>
        %51 = arith.mulf %47, %50 : vector<1x8xf32>
        %c6_24 = arith.constant 6 : index
        %c0_25 = arith.constant 0 : index
        %52 = vector.load %arg9[%c6_24, %c0_25] : memref<8x8xf32, #tpu.memory_space<vmem>>, vector<1x8xf32>
        tpu.vector_store %arg9[%c6_24, %c0_25], %51 {strides = array<i32>} : memref<8x8xf32, #tpu.memory_space<vmem>>, vector<1x8xf32>,
        %c3_26 = arith.constant 3 : index
        %c0_27 = arith.constant 0 : index
        %53 = vector.load %arg5[%c3_26, %c0_27] : memref<4x8xf32, #tpu.memory_space<vmem>>, vector<1x8xf32>
        %54 = arith.mulf %41, %51 : vector<1x8xf32>
        %55 = arith.subf %53, %54 : vector<1x8xf32>
        %c7_28 = arith.constant 7 : index
        %c0_29 = arith.constant 0 : index
        %56 = vector.load %arg9[%c7_28, %c0_29] : memref<8x8xf32, #tpu.memory_space<vmem>>, vector<1x8xf32>
        tpu.vector_store %arg9[%c7_28, %c0_29], %55 {strides = array<i32>} : memref<8x8xf32, #tpu.memory_space<vmem>>, vector<1x8xf32>,
      } else {
      }
      %12 = arith.index_cast %arg1 : i32 to index
      %c0 = arith.constant 0 : index
      %c0_5 = arith.constant 0 : index
      %13 = vector.load %arg8[%12, %c0, %c0_5] : memref<2x64x8xf32, #tpu.memory_space<vmem>>, vector<1x64x8xf32>
      %14 = vector.shape_cast %13 : vector<1x64x8xf32> to vector<64x8xf32>
      %c6 = arith.constant 6 : index
      %c0_6 = arith.constant 0 : index
      %15 = vector.load %arg9[%c6, %c0_6] : memref<8x8xf32, #tpu.memory_space<vmem>>, vector<1x8xf32>
      %16 = vector.broadcast %15 : vector<1x8xf32> to vector<64x8xf32>
      %17 = arith.mulf %14, %16 : vector<64x8xf32>
      %c7 = arith.constant 7 : index
      %c0_7 = arith.constant 0 : index
      %18 = vector.load %arg9[%c7, %c0_7] : memref<8x8xf32, #tpu.memory_space<vmem>>, vector<1x8xf32>
      %19 = vector.broadcast %18 : vector<1x8xf32> to vector<64x8xf32>
      %20 = arith.addf %17, %19 : vector<64x8xf32>
      %c0_8 = arith.constant 0 : index
      %c27 = arith.constant 27 : index
      %c0_9 = arith.constant 0 : index
      %c0_10 = arith.constant 0 : index
      %21 = vector.load %arg2[%c0_8, %c27, %c0_9, %c0_10] : memref<1x36x9x4xf32, #tpu.memory_space<vmem>>, vector<1x8x8x4xf32>
      %22 = vector.shape_cast %21 : vector<1x8x8x4xf32> to vector<8x8x4xf32>
      %23 = vector.shape_cast %22 : vector<8x8x4xf32> to vector<64x4xf32>
      %24 = tpu.iota {dimensions = array<i32: 0>} : vector<4x8xi32>
      %25 = tpu.iota {dimensions = array<i32: 1>} : vector<4x8xi32>
      %c2_i32_11 = arith.constant 2 : i32
      %26 = vector.broadcast %c2_i32_11 : i32 to vector<4x8xi32>
      %27 = arith.addi %24, %26 : vector<4x8xi32>
      %28 = arith.cmpi eq, %25, %27 : vector<4x8xi32>
      %29 = arith.extui %28 : vector<4x8xi1> to vector<4x8xi32>
      %30 = arith.sitofp %29 : vector<4x8xi32> to vector<4x8xf32>
      %cst = arith.constant dense<0.000000e+00> : vector<64x8xf32>
      %31 = tpu.matmul %23, %30, %cst {dimension_numbers = #tpu.dot_dimension_numbers<[1], [0], [0], [1], [0, 0, 1, 1], [], []>} : vector<64x4xf32>, vector<4x8xf32>, vector<64x8xf32> -> vector<64x8xf32>
      %32 = arith.addf %20, %31 : vector<64x8xf32>
      %cst_12 = arith.constant 0.000000e+00 : f32
      %33 = vector.broadcast %cst_12 : f32 to vector<64x8xf32>
      %34 = arith.maximumf %32, %33 : vector<64x8xf32>
      %35 = vector.shape_cast %34 : vector<64x8xf32> to vector<8x8x8xf32>
      %c0_13 = arith.constant 0 : index
      %c0_14 = arith.constant 0 : index
      %c0_15 = arith.constant 0 : index
      %c0_16 = arith.constant 0 : index
      %36 = vector.load %arg6[%c0_13, %c0_14, %c0_15, %c0_16] : memref<1x8x8x8xf32, #tpu.memory_space<vmem>>, vector<1x8x8x8xf32>
      %37 = vector.shape_cast %36 : vector<1x8x8x8xf32> to vector<8x8x8xf32>
      %38 = vector.shape_cast %35 : vector<8x8x8xf32> to vector<1x8x8x8xf32>
      tpu.vector_store %arg6[%c0_13, %c0_14, %c0_15, %c0_16], %38 {strides = array<i32>} : memref<1x8x8x8xf32, #tpu.memory_space<vmem>>, vector<1x8x8x8xf32>,
    } else {
    }
    return
  }
  func.func @transform_0(%arg0: i32, %arg1: i32) -> (i32, i32, i32, i32) {
    %c1_i32 = arith.constant 1 : i32
    %0 = arith.cmpi eq, %arg0, %c1_i32 : i32
    %c0_i32 = arith.constant 0 : i32
    %1 = arith.select %0, %c0_i32, %arg1 : i32
    %c0_i32_0 = arith.constant 0 : i32
    %c0_i32_1 = arith.constant 0 : i32
    %c0_i32_2 = arith.constant 0 : i32
    %c0_i32_3 = arith.constant 0 : i32
    return %1, %c0_i32_0, %c0_i32_1, %c0_i32_2 : i32, i32, i32, i32
  }
  func.func @transform_1(%arg0: i32, %arg1: i32) -> (i32, i32, i32) {
    %c0_i32 = arith.constant 0 : i32
    %c0_i32_0 = arith.constant 0 : i32
    %c0_i32_1 = arith.constant 0 : i32
    %c0_i32_2 = arith.constant 0 : i32
    return %c0_i32, %c0_i32_0, %c0_i32_1 : i32, i32, i32
  }
  func.func @transform_2(%arg0: i32, %arg1: i32) -> (i32, i32, i32) {
    %c0_i32 = arith.constant 0 : i32
    %c0_i32_0 = arith.constant 0 : i32
    %c0_i32_1 = arith.constant 0 : i32
    %c0_i32_2 = arith.constant 0 : i32
    return %c0_i32, %c0_i32_0, %c0_i32_1 : i32, i32, i32
  }
  func.func @transform_3(%arg0: i32, %arg1: i32) -> (i32, i32) {
    %c0_i32 = arith.constant 0 : i32
    %c0_i32_0 = arith.constant 0 : i32
    %c0_i32_1 = arith.constant 0 : i32
    return %c0_i32, %c0_i32_0 : i32, i32
  }
  func.func @transform_4(%arg0: i32, %arg1: i32) -> (i32, i32, i32, i32) {
    %c2_i32 = arith.constant 2 : i32
    %0 = arith.cmpi eq, %arg0, %c2_i32 : i32
    %c0_i32 = arith.constant 0 : i32
    %1 = arith.select %0, %arg1, %c0_i32 : i32
    %c0_i32_0 = arith.constant 0 : i32
    %c0_i32_1 = arith.constant 0 : i32
    %c0_i32_2 = arith.constant 0 : i32
    %c0_i32_3 = arith.constant 0 : i32
    return %1, %c0_i32_0, %c0_i32_1, %c0_i32_2 : i32, i32, i32, i32
  }
}

</mosaic_0001>

<bundles_post_ra>
// kernel: residual_block_forward.1
= control target key start
LH: loop header
LB: loop body
LE: loop exit
PB: predicated region body
PF: predicated region fallthrough
CT: control target
= control target key end

     0   :  { %s2635_s15 = smov 0   ;;  %s2637_s16 = smov 0   ;;  %s3352_s0 = inlined_call_operand.vmem [shape: f32[2,36,9,4], index: 0, kind: input, shape index: {}]   ;;  %s3353_s1 = inlined_call_operand.vmem [shape: f32[9,4,8], index: 1, kind: input, shape index: {}]   ;;  %s3354_s2 = inlined_call_operand.vmem [shape: f32[9,8,8], index: 2, kind: input, shape index: {}]   ;;  %s3355_s3 = inlined_call_operand.vmem [shape: f32[4,8], index: 3, kind: input, shape index: {}]   ;;  %s3356_s4 = inlined_call_operand.vmem [shape: f32[2,8,8,8], index: 4, kind: output, shape index: {}]  }
   0x1   :  { %s2639_s17 = smov 0   ;;  %s2641_s18 = smov 0  }
   0x2   :  { %s2643_s19 = smov 0  }
   0x3 LB: > { %s23_s20 = sadd.s32 1, %s2597_s17  ;;  %s26_s21 = sadd.s32 1, %s2601_s18  ;;  %s2605_s19 = sphi %s2643_s19, %s14_s19   ;;  %s2601_s18 = sphi %s2641_s18, %s3360_s18   ;;  %s2597_s17 = sphi %s2639_s17, %s3359_s17   ;;  %s2593_s16 = sphi %s2637_s16, %s3358_s16   ;;  %s2589_s15 = sphi %s2635_s15, %s3357_s15  }
   0x4   : > { %p24_p0 = scmp.ge.s32.totalorder %s23_s20, 2  ;;  %p2247_p1 = scmp.ge.s32.totalorder %s2605_s19, 1 }
   0x5   : > { %p186_p2 = scmp.lt.s32.totalorder %s2605_s19, 7 }
   0x6   : > { %s3362_s20 = smov (%p24_p0, %s23_s20), 0  ;;  %s3364_s21 = smov (!%p24_p0, %s26_s21), %s2601_s18 }
   0x7   : > { %p187_p3 = pnand %p2247_p1, %p186_p2  ;;  %p28_p4 = scmp.ge.s32.totalorder %s3364_s21, 3 }
   0x8   : > { %p216_p5 = scmp.eq.s32.totalorder (!%p187_p3), %s2593_s16, 1  ;;  %p225_p6 = scmp.eq.s32.totalorder (!%p187_p3), %s2593_s16, 2 }
   0x9   : > { %s3366_s21 = smov (%p28_p4, %s3364_s21), 0  ;;  %190 = sbr.rel (%p187_p3) target bundleno = 886 (0x376), region = 36 }
   0xa   : > { %p2251_p9 = scmp.ne.s32.totalorder (!%p187_p3), %s2593_s16, 0 }
   0xe   : > { %s217_s22 = scalar_select %p216_p5, 0, %s2589_s15 }
   0xf   : > { %s226_s23 = scalar_select %p225_p6, %s2589_s15, 0 }
  0x10   : > { %p218_p7 = scmp.lt.s32.totalorder %s217_s22, 1  ;;  %p2252_p10 = scmp.ne.s32.totalorder (!%p2251_p9), %s2589_s15, 0 }
  0x11   : > { %p227_p8 = scmp.lt.s32.totalorder %s226_s23, 1  ;;  %237 = sbr.rel (%p2251_p9) target bundleno = 325 (0x145), region = 40 }
  0x12   : > { %s3368_s22 = smov (!%p218_p7, %s217_s22), 1 }
  0x13   : > { %s3370_s23 = smov (!%p227_p8, %s226_s23), 1  ;;  %s2515_s24 = smul.u32 576, %s3368_s22 }
  0x14   : > { %s2505_s25 = sshll.u32 %s3370_s23, 6 }
  0x15   : > { %s2676_s28 = scalar_lea.vmem %s3352_s0, %s2515_s24  ;;  %s2681_s5 = scalar_lea.vmem %s3356_s4, %s2505_s25 }
  0x16   : > { %241 = sbr.rel (%p2252_p10) target bundleno = 29 (0x1d), region = 44 }
  0x1b   : > { %vm242_vm0 = vcmask 64512   ;;  %v2607_v0 = vmov 0.0  }
  0x1c   : > { %243 = vst.msk [vmem:[#allocation4] sm:$0xff] %vm242_vm0, %v2607_v0 }
  0x1d PF: > { %v2261_v1 = vld [vmem:[%s3353_s1 + $0x4] sm:$0xf]  ;;  %vm289_vm1 = vcmask 1043456   ;;  %v2689_v2 = vld [vmem:[%s2676_s28 + $0xb0] sm:$0xff]  ;;  %vm264_vm2 = vcmask 31744   ;;  %s2398_s7 = sshll.u32 %s2589_s15, 6 }
  0x1e   : > { %v2692_v3 = vld [vmem:[%s2676_s28 + $0xd0] sm:$0xff]  ;;  %2506 = vmatpush.msk.msra.mxu1 %vm289_vm1, %v2261_v1  ;;  %2507 = vmatpush.msk.msra.mxu2 %vm289_vm1, %v2261_v1  ;;  %v2280_v4 = vld [vmem:[%s3353_s1 + $0x8] sm:$0xf]  ;;  %v2298_v6 = vld [vmem:[%s3353_s1 + $0xc] sm:$0xf]  ;;  %vm1010_vm3 = vcmask 64512  }
  0x1f   : > { %v2700_v5 = vld [vmem:[%s2676_s28 + $0xf0] sm:$0xff]  ;;  %2265 = vmatmul.msk.f32.vlgmr.msra.gmra.mxu1 %vm264_vm2, %v2689_v2  ;;  %2267 = vmatmul.msk.f32.vlgmr.msra.gmra.mxu2 %vm264_vm2, %v2692_v3  ;;  %v252_v7 = vld [vmem:[%s3353_s1] sm:$0xf]  ;;  %v2352_v10 = vld [vmem:[%s3353_s1 + $0x18] sm:$0xf]  ;;  %s2923_s8 = scalar_lea.vmem [#allocation2], %s2398_s7 }
  0x20   : > { %2281 = vmatpush.msk.msrb.mxu2 %vm289_vm1, %v2280_v4  ;;  %2508 = vmatpush.msk.msra.mxu3 %vm289_vm1, %v2261_v1  ;;  %v2253_v8 = vld [vmem:[%s2676_s28 + $0x90] sm:$0xff]  ;;  %v2370_v11 = vld [vmem:[%s3353_s1 + $0x1c] sm:$0xf]  ;;  %v2735_v13 = vld [vmem:[%s2676_s28 + $0xc0] sm:$0xff]  ;;  %vm1042_vm4 = vcmask 57344  }
  0x21   : > { %2269 = vmatmul.msk.f32.vlgmr.msra.gmra.mxu3 %vm264_vm2, %v2700_v5  ;;  %2271 = vmatpush.msk.msrb.mxu1 %vm289_vm1, %v252_v7  ;;  %v2316_v9 = vld [vmem:[%s3353_s1 + $0x10] sm:$0xf]  ;;  %v2334_v12 = vld [vmem:[%s3353_s1 + $0x14] sm:$0xf]  ;;  %v2738_v14 = vld [vmem:[%s2676_s28 + $0xe0] sm:$0xff] }
  0x22   : > { %2299 = vmatpush.msk.msrb.mxu3 %vm289_vm1, %v2298_v6  ;;  %2262 = vmatpush.msk.msra.mxu0 %vm289_vm1, %v2261_v1  ;;  %v2388_v15 = vld [vmem:[%s3353_s1 + $0x20] sm:$0xf]  ;;  %v2308_v21 = vld [vmem:[%s2676_s28 + $0x1b0] sm:$0xff] }
  0x23   : > { %2263 = vmatmul.msk.f32.vlgmr.msra.gmra.mxu0 %vm264_vm2, %v2253_v8  ;;  %2353 = vmatpush.msk.msra.mxu2 %vm289_vm1, %v2352_v10  ;;  %v2748_v16 = vld [vmem:[%s2676_s28 + $0x100] sm:$0xff]  ;;  %v245_v22 = vld [vmem:[%s2676_s28 + $0x10] sm:$0xff] }
  0x24   : > { %2317 = vmatpush.msk.msrb.mxu0 %vm289_vm1, %v2316_v9  ;;  %2371 = vmatpush.msk.msra.mxu3 %vm289_vm1, %v2370_v11  ;;  %v2755_v17 = vld [vmem:[%s2676_s28 + $0xa0] sm:$0xff]  ;;  %v403_v23 = vld [vmem:[%s2676_s28 + $0x11] sm:$0xff] }
  0x25   : > { %2335 = vmatpush.msk.msra.mxu1 %vm289_vm1, %v2334_v12  ;;  %v244_v18 = vld [vmem:[%s2676_s28] sm:$0xff]  ;;  %v2291_v24 = vld [vmem:[%s2676_s28 + $0x130] sm:$0xff] }
  0x26   : > { %2389 = vmatpush.msk.msra.mxu0 %vm289_vm1, %v2388_v15  ;;  %v402_v19 = vld [vmem:[%s2676_s28 + $0x1] sm:$0xff]  ;;  %v2310_v29 = vld [vmem:[%s2676_s28 + $0x1d0] sm:$0xff] }
  0x27   : > { %2266 = vmatmul.msk.f32.gmra.mxu1 %vm264_vm2, %v2735_v13  ;;  %2268 = vmatmul.msk.f32.gmra.mxu2 %vm264_vm2, %v2738_v14  ;;  %v2290_v20 = vld [vmem:[%s2676_s28 + $0x120] sm:$0xff]  ;;  %v247_v30 = vld [vmem:[%s2676_s28 + $0x30] sm:$0xff] }
  0x28   : > { %v2309_v25 = vld [vmem:[%s2676_s28 + $0x1c0] sm:$0xff]  ;;  %v405_v31 = vld [vmem:[%s2676_s28 + $0x31] sm:$0xff] }
  0x29   : > { %2270 = vmatmul.msk.f32.gmra.mxu3 %vm264_vm2, %v2748_v16  ;;  %v246_v26 = vld [vmem:[%s2676_s28 + $0x20] sm:$0xff]  ;;  %v2293_v32 = vld [vmem:[%s2676_s28 + $0x150] sm:$0xff] }
  0x2a   : > { %v404_v27 = vld [vmem:[%s2676_s28 + $0x21] sm:$0xff]  ;;  %v2312_v37 = vld [vmem:[%s2676_s28 + $0x1f0] sm:$0xff] }
  0x2b   : > { %2264 = vmatmul.msk.f32.gmra.mxu0 %vm264_vm2, %v2755_v17  ;;  %v2292_v28 = vld [vmem:[%s2676_s28 + $0x140] sm:$0xff]  ;;  %v249_v38 = vld [vmem:[%s2676_s28 + $0x50] sm:$0xff] }
  0x2c   : > { %v2311_v33 = vld [vmem:[%s2676_s28 + $0x1e0] sm:$0xff]  ;;  %v407_v39 = vld [vmem:[%s2676_s28 + $0x51] sm:$0xff] }
  0x2d   : > { %v248_v34 = vld [vmem:[%s2676_s28 + $0x40] sm:$0xff]  ;;  %v2295_v40 = vld [vmem:[%s2676_s28 + $0x170] sm:$0xff] }
  0x2e   : > { %v406_v35 = vld [vmem:[%s2676_s28 + $0x41] sm:$0xff]  ;;  %v2314_v45 = vld [vmem:[%s2676_s28 + $0x210] sm:$0xff] }
  0x2f   : > { %2272 = vmatmul.msk.f32.vlgmr.msrb.gmra.mxu1 %vm264_vm2, %v244_v18  ;;  %2282 = vmatmul.msk.f32.vlgmr.msrb.gmra.mxu2 %vm264_vm2, %v402_v19  ;;  %v2294_v36 = vld [vmem:[%s2676_s28 + $0x160] sm:$0xff]  ;;  %v251_v46 = vld [vmem:[%s2676_s28 + $0x70] sm:$0xff] }
  0x30   : > { %v2313_v41 = vld [vmem:[%s2676_s28 + $0x200] sm:$0xff]  ;;  %v409_v47 = vld [vmem:[%s2676_s28 + $0x71] sm:$0xff] }
  0x31   : > { %2300 = vmatmul.msk.f32.vlgmr.msrb.gmra.mxu3 %vm264_vm2, %v2290_v20  ;;  %v250_v42 = vld [vmem:[%s2676_s28 + $0x60] sm:$0xff]  ;;  %v2297_v48 = vld [vmem:[%s2676_s28 + $0x190] sm:$0xff] }
  0x32   : > { %v408_v43 = vld [vmem:[%s2676_s28 + $0x61] sm:$0xff]  ;;  %v2327_v51 = vld [vmem:[%s2676_s28 + $0x131] sm:$0xff] }
  0x33   : > { %2318 = vmatmul.msk.f32.vlgmr.msrb.gmra.mxu0 %vm264_vm2, %v2308_v21  ;;  %v2296_v44 = vld [vmem:[%s2676_s28 + $0x180] sm:$0xff]  ;;  %v2329_v53 = vld [vmem:[%s2676_s28 + $0x151] sm:$0xff] }
  0x34   : > { %v2315_v49 = vld [vmem:[%s2676_s28 + $0x220] sm:$0xff]  ;;  %v2331_v55 = vld [vmem:[%s2676_s28 + $0x171] sm:$0xff] }
  0x35   : > { %v2326_v50 = vld [vmem:[%s2676_s28 + $0x121] sm:$0xff]  ;;  %v2333_v62 = vld [vmem:[%s2676_s28 + $0x191] sm:$0xff] }
  0x36   : > { %v2328_v52 = vld [vmem:[%s2676_s28 + $0x141] sm:$0xff]  ;;  %v2369_v0 = vld [vmem:[%s2676_s28 + $0x110] sm:$0xff] }
  0x37   : > { %2273 = vmatmul.msk.f32.gmra.mxu1 %vm264_vm2, %v245_v22  ;;  %2283 = vmatmul.msk.f32.gmra.mxu2 %vm264_vm2, %v403_v23  ;;  %v2330_v54 = vld [vmem:[%s2676_s28 + $0x161] sm:$0xff] }
  0x38   : > { %v2332_v57 = vld [vmem:[%s2676_s28 + $0x181] sm:$0xff] }
  0x39   : > { %2301 = vmatmul.msk.f32.gmra.mxu3 %vm264_vm2, %v2291_v24  ;;  %v2351_v63 = vld [vmem:[%s2676_s28 + $0x80] sm:$0xff] }
  0x3b   : > { %2319 = vmatmul.msk.f32.gmra.mxu0 %vm264_vm2, %v2309_v25 }
  0x3f   : > { %2274 = vmatmul.msk.f32.gmra.mxu1 %vm264_vm2, %v246_v26  ;;  %2284 = vmatmul.msk.f32.gmra.mxu2 %vm264_vm2, %v404_v27 }
  0x41   : > { %2302 = vmatmul.msk.f32.gmra.mxu3 %vm264_vm2, %v2292_v28 }
  0x43   : > { %2320 = vmatmul.msk.f32.gmra.mxu0 %vm264_vm2, %v2310_v29 }
  0x47   : > { %2275 = vmatmul.msk.f32.gmra.mxu1 %vm264_vm2, %v247_v30  ;;  %2285 = vmatmul.msk.f32.gmra.mxu2 %vm264_vm2, %v405_v31 }
  0x49   : > { %2303 = vmatmul.msk.f32.gmra.mxu3 %vm264_vm2, %v2293_v32 }
  0x4b   : > { %2321 = vmatmul.msk.f32.gmra.mxu0 %vm264_vm2, %v2311_v33 }
  0x4f   : > { %2276 = vmatmul.msk.f32.gmra.mxu1 %vm264_vm2, %v248_v34  ;;  %2286 = vmatmul.msk.f32.gmra.mxu2 %vm264_vm2, %v406_v35 }
  0x51   : > { %2304 = vmatmul.msk.f32.gmra.mxu3 %vm264_vm2, %v2294_v36 }
  0x53   : > { %2322 = vmatmul.msk.f32.gmra.mxu0 %vm264_vm2, %v2312_v37 }
  0x57   : > { %2277 = vmatmul.msk.f32.gmra.mxu1 %vm264_vm2, %v249_v38  ;;  %2287 = vmatmul.msk.f32.gmra.mxu2 %vm264_vm2, %v407_v39 }
  0x59   : > { %2305 = vmatmul.msk.f32.gmra.mxu3 %vm264_vm2, %v2295_v40 }
  0x5b   : > { %2323 = vmatmul.msk.f32.gmra.mxu0 %vm264_vm2, %v2313_v41 }
  0x5f   : > { %2278 = vmatmul.msk.f32.gmra.mxu1 %vm264_vm2, %v250_v42  ;;  %2288 = vmatmul.msk.f32.gmra.mxu2 %vm264_vm2, %v408_v43 }
  0x61   : > { %2306 = vmatmul.msk.f32.gmra.mxu3 %vm264_vm2, %v2296_v44 }
  0x63   : > { %2324 = vmatmul.msk.f32.gmra.mxu0 %vm264_vm2, %v2314_v45 }
  0x67   : > { %2279 = vmatmul.msk.f32.gmra.mxu1 %vm264_vm2, %v251_v46  ;;  %2289 = vmatmul.msk.f32.gmra.mxu2 %vm264_vm2, %v409_v47 }
  0x69   : > { %2307 = vmatmul.msk.f32.gmra.mxu3 %vm264_vm2, %v2297_v48 }
  0x6b   : > { %2325 = vmatmul.msk.f32.gmra.mxu0 %vm264_vm2, %v2315_v49 }
  0x6f   : > { %2336 = vmatmul.msk.f32.vlgmr.msra.gmra.mxu1 %vm264_vm2, %v2326_v50  ;;  %2354 = vmatmul.msk.f32.vlgmr.msra.gmra.mxu2 %vm264_vm2, %v245_v22 }
  0x71   : > { %2372 = vmatmul.msk.f32.vlgmr.msra.gmra.mxu3 %vm264_vm2, %v2755_v17 }
  0x73   : > { %2390 = vmatmul.msk.f32.vlgmr.msra.gmra.mxu0 %vm264_vm2, %v403_v23 }
  0x77   : > { %2337 = vmatmul.msk.f32.gmra.mxu1 %vm264_vm2, %v2327_v51  ;;  %2355 = vmatmul.msk.f32.gmra.mxu2 %vm264_vm2, %v246_v26 }
  0x79   : > { %2373 = vmatmul.msk.f32.gmra.mxu3 %vm264_vm2, %v2689_v2  ;;  %v2387_v2 = vld [vmem:[%s2676_s28 + $0x81] sm:$0xff] }
  0x7b   : > { %2391 = vmatmul.msk.f32.gmra.mxu0 %vm264_vm2, %v404_v27 }
  0x7f   : > { %2338 = vmatmul.msk.f32.gmra.mxu1 %vm264_vm2, %v2328_v52  ;;  %2356 = vmatmul.msk.f32.gmra.mxu2 %vm264_vm2, %v247_v30 }
  0x81   : > { %2374 = vmatmul.msk.f32.gmra.mxu3 %vm264_vm2, %v2735_v13 }
  0x83   : > { %2392 = vmatmul.msk.f32.gmra.mxu0 %vm264_vm2, %v405_v31 }
  0x87   : > { %2339 = vmatmul.msk.f32.gmra.mxu1 %vm264_vm2, %v2329_v53  ;;  %2357 = vmatmul.msk.f32.gmra.mxu2 %vm264_vm2, %v248_v34 }
  0x89   : > { %2375 = vmatmul.msk.f32.gmra.mxu3 %vm264_vm2, %v2692_v3 }
  0x8b   : > { %2393 = vmatmul.msk.f32.gmra.mxu0 %vm264_vm2, %v406_v35 }
  0x8f   : > { %2340 = vmatmul.msk.f32.gmra.mxu1 %vm264_vm2, %v2330_v54  ;;  %2358 = vmatmul.msk.f32.gmra.mxu2 %vm264_vm2, %v249_v38 }
  0x91   : > { %2376 = vmatmul.msk.f32.gmra.mxu3 %vm264_vm2, %v2738_v14 }
  0x93   : > { %2394 = vmatmul.msk.f32.gmra.mxu0 %vm264_vm2, %v407_v39 }
  0x97   : > { %2341 = vmatmul.msk.f32.gmra.mxu1 %vm264_vm2, %v2331_v55  ;;  %2359 = vmatmul.msk.f32.gmra.mxu2 %vm264_vm2, %v250_v42 }
  0x99   : > { %2377 = vmatmul.msk.f32.gmra.mxu3 %vm264_vm2, %v2700_v5 }
  0x9b   : > { %2395 = vmatmul.msk.f32.gmra.mxu0 %vm264_vm2, %v408_v43 }
  0x9c   : > { %v2861_v56 = vpop.f32.mrf.mxu1 }
  0x9f   : > { %2342 = vmatmul.msk.f32.gmra.mxu1 %vm264_vm2, %v2332_v57  ;;  %2360 = vmatmul.msk.f32.gmra.mxu2 %vm264_vm2, %v251_v46 }
  0xa0   : > { %v310_v58 = vpop.f32.mrf.mxu0 }
  0xa1   : > { %2378 = vmatmul.msk.f32.gmra.mxu3 %vm264_vm2, %v2748_v16 }
  0xa2   : > { %v2868_v59 = vpop.f32.mrf.mxu2 }
  0xa3   : > { %2396 = vmatmul.msk.f32.gmra.mxu0 %vm264_vm2, %v409_v47 }
  0xa4   : > { %v2871_v60 = vpop.f32.mrf.mxu1  ;;  %v2873_v61 = vpop.f32.mrf.mxu3 }
  0xa7   : > { %2343 = vmatmul.msk.f32.gmra.mxu1 %vm264_vm2, %v2333_v62  ;;  %2361 = vmatmul.msk.f32.gmra.mxu2 %vm264_vm2, %v2351_v63 }
  0xa8   : > { %v313_v1 = vpop.f32.mrf.mxu0 }
  0xa9   : > { %2379 = vmatmul.msk.f32.gmra.mxu3 %vm264_vm2, %v2369_v0 }
  0xaa   : > { %v2882_v3 = vpop.f32.mrf.mxu2 }
  0xab   : > { %2397 = vmatmul.msk.f32.gmra.mxu0 %vm264_vm2, %v2387_v2 }
  0xac   : > { %v2885_v4 = vpop.f32.mrf.mxu3  ;;  %v378_v5 = vpop.f32.mrf.mxu1 }
  0xad   : > { %v379_v34 = vadd.f32 %v378_v5, %v310_v58 }
  0xb0   : > { %v630_v6 = vpop.f32.mrf.mxu0 }
  0xb2   : > { %v456_v7 = vpop.f32.mrf.mxu2 }
  0xb3   : > { %v480_v35 = vadd.f32 %v456_v7, %v379_v34 }
  0xb4   : > { %v381_v8 = vpop.f32.mrf.mxu1  ;;  %v543_v9 = vpop.f32.mrf.mxu3 }
  0xb5   : > { %v567_v38 = vadd.f32 %v543_v9, %v480_v35  ;;  %v382_v41 = vadd.f32 %v381_v8, %v313_v1 }
  0xb7   : > { %v654_v42 = vadd.f32 %v630_v6, %v567_v38 }
  0xb8   : > { %v633_v10 = vpop.f32.mrf.mxu0 }
  0xba   : > { %v459_v11 = vpop.f32.mrf.mxu2 }
  0xbb   : > { %v481_v43 = vadd.f32 %v459_v11, %v382_v41 }
  0xbc   : > { %v384_v12 = vpop.f32.mrf.mxu1  ;;  %v546_v13 = vpop.f32.mrf.mxu3 }
  0xbd   : > { %v568_v47 = vadd.f32 %v546_v13, %v481_v43  ;;  %v385_v51 = vadd.f32 %v384_v12, %v2861_v56 }
  0xbf   : > { %v655_v53 = vadd.f32 %v633_v10, %v568_v47 }
  0xc0   : > { %v636_v14 = vpop.f32.mrf.mxu0 }
  0xc2   : > { %v462_v15 = vpop.f32.mrf.mxu2 }
  0xc3   : > { %v482_v54 = vadd.f32 %v462_v15, %v385_v51 }
  0xc4   : > { %v387_v16 = vpop.f32.mrf.mxu1  ;;  %v549_v17 = vpop.f32.mrf.mxu3 }
  0xc5   : > { %v569_v63 = vadd.f32 %v549_v17, %v482_v54  ;;  %v388_v56 = vadd.f32 %v387_v16, %v2871_v60 }
  0xc7   : > { %v656_v6 = vadd.f32 %v636_v14, %v569_v63 }
  0xc8   : > { %v2887_v18 = vpop.f32.mrf.mxu0 }
  0xca   : > { %v465_v19 = vpop.f32.mrf.mxu2 }
  0xcb   : > { %v483_v7 = vadd.f32 %v465_v19, %v388_v56 }
  0xcc   : > { %v2889_v20 = vpop.f32.mrf.mxu1  ;;  %v552_v21 = vpop.f32.mrf.mxu3 }
  0xcd   : > { %v570_v35 = vadd.f32 %v552_v21, %v483_v7  ;;  %v391_v41 = vadd.f32 %v2889_v20, %v2868_v59 }
  0xcf   : > { %v657_v43 = vadd.f32 %v2887_v18, %v570_v35 }
  0xd0   : > { %v2891_v22 = vpop.f32.mrf.mxu0 }
  0xd2   : > { %v2893_v23 = vpop.f32.mrf.mxu2 }
  0xd4   : > { %v2895_v24 = vpop.f32.mrf.mxu1  ;;  %v2897_v25 = vpop.f32.mrf.mxu3 }
  0xd8   : > { %v2899_v26 = vpop.f32.mrf.mxu0 }
  0xda   : > { %v2901_v27 = vpop.f32.mrf.mxu2 }
  0xdc   : > { %v2903_v28 = vpop.f32.mrf.mxu1  ;;  %v2905_v29 = vpop.f32.mrf.mxu3 }
  0xe0   : > { %v2907_v30 = vpop.f32.mrf.mxu0 }
  0xe2   : > { %v2909_v31 = vpop.f32.mrf.mxu2 }
  0xe4   : > { %v2911_v32 = vpop.f32.mrf.mxu1  ;;  %v2913_v33 = vpop.f32.mrf.mxu3 }
  0xe8   : > { %v2915_v36 = vpop.f32.mrf.mxu0 }
  0xea   : > { %v2917_v37 = vpop.f32.mrf.mxu2 }
  0xec   : > { %v2919_v39 = vpop.f32.mrf.mxu3  ;;  %v716_v40 = vpop.f32.mrf.mxu1 }
  0xed   : > { %v740_v45 = vadd.f32 %v716_v40, %v654_v42 }
  0xf0   : > { %v976_v44 = vpop.f32.mrf.mxu0 }
  0xf2   : > { %v803_v46 = vpop.f32.mrf.mxu2 }
  0xf3   : > { %v827_v48 = vadd.f32 %v803_v46, %v740_v45 }
  0xf4   : > { %v719_v49 = vpop.f32.mrf.mxu1  ;;  %v890_v50 = vpop.f32.mrf.mxu3 }
  0xf5   : > { %v914_v52 = vadd.f32 %v890_v50, %v827_v48  ;;  %v741_v58 = vadd.f32 %v719_v49, %v655_v53 }
  0xf7   : > { %v1000_v55 = vadd.f32 %v976_v44, %v914_v52  ;;  %v484_v44 = vadd.f32 %v2893_v23, %v391_v41  ;;  %v394_v23 = vadd.f32 %v2895_v24, %v2882_v3 }
  0xf8   : > { %v979_v57 = vpop.f32.mrf.mxu0 }
  0xf9   : > { %1011 = vst.msk [vmem:[%s2923_s8] sm:$0xff] %vm1010_vm3, %v1000_v55  ;;  %v1045_v8 = vmul.f32 %v1000_v55, %v1000_v55  ;;  %v1020_v11 = vsel %vm1010_vm3, %v1000_v55, 0.0  ;;  %v571_v51 = vadd.f32 %v2897_v25, %v484_v44 }
  0xfa   : > { %v806_v62 = vpop.f32.mrf.mxu2 }
  0xfb   : > { %v828_v0 = vadd.f32 %v806_v62, %v741_v58  ;;  %v1053_v60 = vsel %vm1010_vm3, %v1045_v8, 0.0  ;;  %v658_v55 = vadd.f32 %v2891_v22, %v571_v51 }
  0xfc   : > { %v722_v1 = vpop.f32.mrf.mxu1  ;;  %v893_v2 = vpop.f32.mrf.mxu3 }
  0xfd   : > { %v915_v5 = vadd.f32 %v893_v2, %v828_v0  ;;  %v742_v12 = vadd.f32 %v722_v1, %v656_v6 }
  0xff   : > { %v1001_v9 = vadd.f32 %v979_v57, %v915_v5  ;;  %v485_v57 = vadd.f32 %v2901_v27, %v394_v23  ;;  %v397_v27 = vadd.f32 %v2903_v28, %v2873_v61 }
 0x100   : > { %v982_v10 = vpop.f32.mrf.mxu0 }
 0x101   : > { %1012 = vst.msk [vmem:[%s2923_s8 + $0x8] sm:$0xff] %vm1010_vm3, %v1001_v9  ;;  %v1021_v13 = vsel %vm1010_vm3, %v1001_v9, 0.0  ;;  %v1046_v15 = vmul.f32 %v1001_v9, %v1001_v9  ;;  %v572_v56 = vadd.f32 %v2905_v29, %v485_v57  ;;  %v486_v9 = vadd.f32 %v2909_v31, %v397_v27 }
 0x102   : > { %v1022_v17 = vadd.f32 %v1021_v13, %v1020_v11  ;;  %v809_v34 = vpop.f32.mrf.mxu2  ;;  %v400_v31 = vadd.f32 %v2911_v32, %v2885_v4 }
 0x103   : > { %v1054_v14 = vsel %vm1010_vm3, %v1046_v15, 0.0  ;;  %v829_v16 = vadd.f32 %v809_v34, %v742_v12  ;;  %v659_v8 = vadd.f32 %v2899_v26, %v572_v56  ;;  %v573_v34 = vadd.f32 %v2913_v33, %v486_v9 }
 0x104   : > { %v1055_v19 = vadd.f32 %v1054_v14, %v1053_v60  ;;  %v725_v38 = vpop.f32.mrf.mxu1  ;;  %v896_v40 = vpop.f32.mrf.mxu3 }
 0x105   : > { %v916_v42 = vadd.f32 %v896_v40, %v829_v16  ;;  %v743_v47 = vadd.f32 %v725_v38, %v657_v43  ;;  %v660_v16 = vadd.f32 %v2907_v30, %v573_v34 }
 0x107   : > { %v1002_v45 = vadd.f32 %v982_v10, %v916_v42 }
 0x108   : > { %v985_v46 = vpop.f32.mrf.mxu0 }
 0x109   : > { %1013 = vst.msk [vmem:[%s2923_s8 + $0x10] sm:$0xff] %vm1010_vm3, %v1002_v45  ;;  %v1023_v21 = vsel %vm1010_vm3, %v1002_v45, 0.0  ;;  %v1047_v48 = vmul.f32 %v1002_v45, %v1002_v45 }
 0x10a   : > { %v1024_v49 = vadd.f32 %v1023_v21, %v1022_v17  ;;  %v812_v50 = vpop.f32.mrf.mxu2 }
 0x10b   : > { %v1056_v59 = vsel %vm1010_vm3, %v1047_v48, 0.0  ;;  %v830_v20 = vadd.f32 %v812_v50, %v743_v47 }
 0x10c   : > { %v1057_v52 = vadd.f32 %v1056_v59, %v1055_v19  ;;  %v728_v18 = vpop.f32.mrf.mxu1  ;;  %v899_v53 = vpop.f32.mrf.mxu3  ;;  %v487_v19 = vadd.f32 %v2917_v37, %v400_v31 }
 0x10d   : > { %v917_v54 = vadd.f32 %v899_v53, %v830_v20  ;;  %v744_v63 = vadd.f32 %v728_v18, %v658_v55 }
 0x10e   : > { %v574_v45 = vadd.f32 %v2919_v39, %v487_v19 }
 0x10f   : > { %v1003_v58 = vadd.f32 %v985_v46, %v917_v54 }
 0x110   : > { %v988_v62 = vpop.f32.mrf.mxu0  ;;  %v661_v21 = vadd.f32 %v2915_v36, %v574_v45 }
 0x111   : > { %1014 = vst.msk [vmem:[%s2923_s8 + $0x18] sm:$0xff] %vm1010_vm3, %v1003_v58  ;;  %v1025_v25 = vsel %vm1010_vm3, %v1003_v58, 0.0  ;;  %v1048_v0 = vmul.f32 %v1003_v58, %v1003_v58 }
 0x112   : > { %v1026_v1 = vadd.f32 %v1025_v25, %v1024_v49  ;;  %v815_v2 = vpop.f32.mrf.mxu2 }
 0x113   : > { %v1058_v3 = vsel %vm1010_vm3, %v1048_v0, 0.0  ;;  %v831_v24 = vadd.f32 %v815_v2, %v744_v63 }
 0x114   : > { %v1059_v5 = vadd.f32 %v1058_v3, %v1057_v52  ;;  %v731_v22 = vpop.f32.mrf.mxu1  ;;  %v902_v6 = vpop.f32.mrf.mxu3 }
 0x115   : > { %v918_v7 = vadd.f32 %v902_v6, %v831_v24  ;;  %v745_v12 = vadd.f32 %v731_v22, %v659_v8  ;;  %v1019_v6 = vld [vmem:[#allocation4] sm:$0x1]  ;;  %v1044_v8 = vld [vmem:[#allocation4 + $0x1] sm:$0x1] }
 0x117   : > { %v1004_v10 = vadd.f32 %v988_v62, %v918_v7 }
 0x118   : > { %v991_v11 = vpop.f32.mrf.mxu0 }
 0x119   : > { %1015 = vst.msk [vmem:[%s2923_s8 + $0x20] sm:$0xff] %vm1010_vm3, %v1004_v10  ;;  %v1027_v29 = vsel %vm1010_vm3, %v1004_v10, 0.0  ;;  %v1049_v13 = vmul.f32 %v1004_v10, %v1004_v10 }
 0x11a   : > { %v1028_v15 = vadd.f32 %v1027_v29, %v1026_v1  ;;  %v818_v17 = vpop.f32.mrf.mxu2 }
 0x11b   : > { %v1060_v61 = vsel %vm1010_vm3, %v1049_v13, 0.0  ;;  %v832_v28 = vadd.f32 %v818_v17, %v745_v12 }
 0x11c   : > { %v1061_v35 = vadd.f32 %v1060_v61, %v1059_v5  ;;  %v734_v26 = vpop.f32.mrf.mxu1  ;;  %v905_v60 = vpop.f32.mrf.mxu3 }
 0x11d   : > { %v919_v14 = vadd.f32 %v905_v60, %v832_v28  ;;  %v746_v40 = vadd.f32 %v734_v26, %v660_v16 }
 0x11f   : > { %v1005_v38 = vadd.f32 %v991_v11, %v919_v14 }
 0x120   : > { %v994_v44 = vpop.f32.mrf.mxu0 }
 0x121   : > { %1016 = vst.msk [vmem:[%s2923_s8 + $0x28] sm:$0xff] %vm1010_vm3, %v1005_v38  ;;  %v1029_v33 = vsel %vm1010_vm3, %v1005_v38, 0.0  ;;  %v1050_v41 = vmul.f32 %v1005_v38, %v1005_v38 }
 0x122   : > { %v1030_v42 = vadd.f32 %v1029_v33, %v1028_v15  ;;  %v821_v43 = vpop.f32.mrf.mxu2 }
 0x123   : > { %v1062_v4 = vsel %vm1010_vm3, %v1050_v41, 0.0  ;;  %v833_v32 = vadd.f32 %v821_v43, %v746_v40 }
 0x124   : > { %v1063_v46 = vadd.f32 %v1062_v4, %v1061_v35  ;;  %v908_v30 = vpop.f32.mrf.mxu3  ;;  %v737_v37 = vpop.f32.mrf.mxu1 }
 0x125   : > { %v920_v47 = vadd.f32 %v908_v30, %v833_v32  ;;  %v747_v49 = vadd.f32 %v737_v37, %v661_v21 }
 0x127   : > { %v1006_v48 = vadd.f32 %v994_v44, %v920_v47 }
 0x128   : > { %v997_v23 = vpop.f32.mrf.mxu0 }
 0x129   : > { %1017 = vst.msk [vmem:[%s2923_s8 + $0x30] sm:$0xff] %vm1010_vm3, %v1006_v48  ;;  %v1031_v50 = vsel %vm1010_vm3, %v1006_v48, 0.0  ;;  %v1051_v51 = vmul.f32 %v1006_v48, %v1006_v48 }
 0x12a   : > { %v1032_v59 = vadd.f32 %v1031_v50, %v1030_v42  ;;  %v824_v20 = vpop.f32.mrf.mxu2 }
 0x12b   : > { %v1064_v39 = vsel %vm1010_vm3, %v1051_v51, 0.0  ;;  %v834_v52 = vadd.f32 %v824_v20, %v747_v49 }
 0x12c   : > { %v1065_v18 = vadd.f32 %v1064_v39, %v1063_v46  ;;  %v911_v53 = vpop.f32.mrf.mxu3 }
 0x12d   : > { %v921_v54 = vadd.f32 %v911_v53, %v834_v52 }
 0x12f   : > { %v1007_v55 = vadd.f32 %v997_v23, %v921_v54 }
 0x131   : > { %1018 = vst.msk [vmem:[%s2923_s8 + $0x38] sm:$0xff] %vm1010_vm3, %v1007_v55  ;;  %v1033_v36 = vsel %vm1010_vm3, %v1007_v55, 0.0  ;;  %v1052_v57 = vmul.f32 %v1007_v55, %v1007_v55 }
 0x132   : > { %v1034_v58 = vadd.f32 %v1033_v36, %v1032_v59 }
 0x133   : > { %v1066_v62 = vsel %vm1010_vm3, %v1052_v57, 0.0 }
 0x134   : > { %v1035_v63 = vrot.slane %v1034_v58, 4  ;;  %v1067_v25 = vadd.f32 %v1066_v62, %v1065_v18 }
 0x136   : > { %v1036_v0 = vadd.f32 %v1035_v63, %v1034_v58  ;;  %v1068_v1 = vrot.slane %v1067_v25, 4 }
 0x138   : > { %v1037_v2 = vrot.slane %v1036_v0, 2  ;;  %v1069_v56 = vadd.f32 %v1068_v1, %v1067_v25 }
 0x13a   : > { %v1038_v3 = vadd.f32 %v1037_v2, %v1036_v0  ;;  %v1070_v24 = vrot.slane %v1069_v56, 2 }
 0x13c   : > { %v1039_v5 = vrot.slane %v1038_v3, 1  ;;  %v1071_v22 = vadd.f32 %v1070_v24, %v1069_v56 }
 0x13e   : > { %v1040_v27 = vadd.f32 %v1039_v5, %v1038_v3  ;;  %v1072_v7 = vrot.slane %v1071_v22, 1 }
 0x140   : > { %v1041_v9 = vadd.f32 %v1040_v27, %v1019_v6  ;;  %v1073_v10 = vadd.f32 %v1072_v7, %v1071_v22 }
 0x142   : > { %1043 = vst.msk [vmem:[#allocation4] sm:$0x1] %vm1042_vm4, %v1041_v9  ;;  %v1074_v11 = vadd.f32 %v1073_v10, %v1044_v8 }
 0x144   : > { %1075 = vst.msk [vmem:[#allocation4 + $0x1] sm:$0x1] %vm1042_vm4, %v1074_v11 }
 0x145 PF: > { %p2399_p11 = scmp.ne.s32.totalorder %s2593_s16, 1 }
 0x146   : > { %p2400_p12 = scmp.ne.s32.totalorder (!%p2399_p11), %s2589_s15, 0 }
 0x147   : > { %1079 = sbr.rel (%p2399_p11) target bundleno = 685 (0x2ad), region = 48 }
 0x14c   : > { %1083 = sbr.rel (%p2400_p12) target bundleno = 372 (0x174), region = 52 }
 0x151   : > { %v1084_v12 = vld [vmem:[#allocation4] sm:$0x1]  ;;  %v1086_v29 = vld [vmem:[#allocation4 + $0x1] sm:$0x1]  ;;  %vm1103_vm5 = vcmask 57344   ;;  %v2608_v17 = vmov 0.0  }
 0x152   : > { %v1085_v13 = vmul.f32 0.0078125, %v1084_v12  ;;  %v1087_v15 = vmul.f32 0.0078125, %v1086_v29  ;;  %1109 = vst.msk [vmem:[#allocation4 + $0x2] sm:$0x1] %vm1103_vm5, %v2608_v17  ;;  %vm1111_vm6 = vcmask 64512  }
 0x153   : > { %1110 = vst.msk [vmem:[#allocation4 + $0x3] sm:$0x1] %vm1103_vm5, %v2608_v17  ;;  %v1090_v16 = vld [vmem:[%s3355_s3] sm:$0x1]  ;;  %v1105_v33 = vld [vmem:[%s3355_s3 + $0x1] sm:$0x1] }
 0x154   : > { %v1088_v34 = vmul.f32 %v1085_v13, %v1085_v13  ;;  %1112 = vst.msk [vmem:[#allocation5] sm:$0xff] %vm1111_vm6, %v2608_v17 }
 0x155   : > { %1113 = vst.msk [vmem:[#allocation5 + $0x8] sm:$0xff] %vm1111_vm6, %v2608_v17 }
 0x156   : > { %v1089_v61 = vsub.f32 %v1087_v15, %v1088_v34  ;;  %1114 = vst.msk [vmem:[#allocation5 + $0x10] sm:$0xff] %vm1111_vm6, %v2608_v17 }
 0x157   : > { %1115 = vst.msk [vmem:[#allocation5 + $0x18] sm:$0xff] %vm1111_vm6, %v2608_v17 }
 0x158   : > { %v1091_v28 = vadd.f32 1e-05, %v1089_v61  ;;  %1116 = vst.msk [vmem:[#allocation5 + $0x20] sm:$0xff] %vm1111_vm6, %v2608_v17 }
 0x159   : > { %1117 = vst.msk [vmem:[#allocation5 + $0x28] sm:$0xff] %vm1111_vm6, %v2608_v17 }
 0x15a   : > { %2559 = vrsqrt.f32 %v1091_v28  ;;  %1118 = vst.msk [vmem:[#allocation5 + $0x30] sm:$0xff] %vm1111_vm6, %v2608_v17  ;;  %vm1098_vm7 = vweird.f32 %v1091_v28 }
 0x15b   : > { %1119 = vst.msk [vmem:[#allocation5 + $0x38] sm:$0xff] %vm1111_vm6, %v2608_v17 }
 0x15c   : > { %1120 = vst.msk [vmem:[#allocation5 + $0x40] sm:$0xff] %vm1111_vm6, %v2608_v17 }
 0x15d   : > { %1121 = vst.msk [vmem:[#allocation5 + $0x48] sm:$0xff] %vm1111_vm6, %v2608_v17 }
 0x15e   : > { %1122 = vst.msk [vmem:[#allocation5 + $0x50] sm:$0xff] %vm1111_vm6, %v2608_v17 }
 0x15f   : > { %1123 = vst.msk [vmem:[#allocation5 + $0x58] sm:$0xff] %vm1111_vm6, %v2608_v17 }
 0x160   : > { %v2560_v35 = vpop.eup %2559  ;;  %1124 = vst.msk [vmem:[#allocation5 + $0x60] sm:$0xff] %vm1111_vm6, %v2608_v17 }
 0x161   : > { %v1093_v26 = vmul.f32 %v2560_v35, %v1091_v28  ;;  %1125 = vst.msk [vmem:[#allocation5 + $0x68] sm:$0xff] %vm1111_vm6, %v2608_v17  ;;  %vm1099_vm8 = vweird.f32 %v2560_v35 }
 0x162   : > { %1126 = vst.msk [vmem:[#allocation5 + $0x70] sm:$0xff] %vm1111_vm6, %v2608_v17  ;;  %vm1100_vm9 = vmor %vm1098_vm7, %vm1099_vm8 }
 0x163   : > { %v1094_v60 = vmul.f32 %v2560_v35, %v1093_v26  ;;  %1127 = vst.msk [vmem:[#allocation5 + $0x78] sm:$0xff] %vm1111_vm6, %v2608_v17 }
 0x164   : > { %1128 = vst.msk [vmem:[#allocation5 + $0x80] sm:$0xff] %vm1111_vm6, %v2608_v17 }
 0x165   : > { %v1095_v31 = vmul.f32 0.5, %v1094_v60  ;;  %1129 = vst.msk [vmem:[#allocation5 + $0x88] sm:$0xff] %vm1111_vm6, %v2608_v17 }
 0x166   : > { %1130 = vst.msk [vmem:[#allocation5 + $0x90] sm:$0xff] %vm1111_vm6, %v2608_v17 }
 0x167   : > { %v1096_v14 = vsub.f32 1.5, %v1095_v31  ;;  %1131 = vst.msk [vmem:[#allocation5 + $0x98] sm:$0xff] %vm1111_vm6, %v2608_v17 }
 0x168   : > { %1132 = vst.msk [vmem:[#allocation5 + $0xa0] sm:$0xff] %vm1111_vm6, %v2608_v17 }
 0x169   : > { %v1097_v19 = vmul.f32 %v2560_v35, %v1096_v14  ;;  %1133 = vst.msk [vmem:[#allocation5 + $0xa8] sm:$0xff] %vm1111_vm6, %v2608_v17 }
 0x16a   : > { %1134 = vst.msk [vmem:[#allocation5 + $0xb0] sm:$0xff] %vm1111_vm6, %v2608_v17 }
 0x16b   : > { %v1101_v38 = vsel %vm1100_vm9, %v2560_v35, %v1097_v19  ;;  %1135 = vst.msk [vmem:[#allocation5 + $0xb8] sm:$0xff] %vm1111_vm6, %v2608_v17 }
 0x16c   : > { %v1102_v40 = vmul.f32 %v1101_v38, %v1090_v16  ;;  %1136 = vst.msk [vmem:[#allocation5 + $0xc0] sm:$0xff] %vm1111_vm6, %v2608_v17 }
 0x16d   : > { %1137 = vst.msk [vmem:[#allocation5 + $0xc8] sm:$0xff] %vm1111_vm6, %v2608_v17 }
 0x16e   : > { %1104 = vst.msk [vmem:[#allocation4 + $0x4] sm:$0x1] %vm1103_vm5, %v1102_v40  ;;  %v1106_v41 = vmul.f32 %v1102_v40, %v1085_v13 }
 0x16f   : > { %1138 = vst.msk [vmem:[#allocation5 + $0xd0] sm:$0xff] %vm1111_vm6, %v2608_v17 }
 0x170   : > { %v1107_v42 = vsub.f32 %v1105_v33, %v1106_v41  ;;  %1139 = vst.msk [vmem:[#allocation5 + $0xd8] sm:$0xff] %vm1111_vm6, %v2608_v17 }
 0x171   : > { %1140 = vst.msk [vmem:[#allocation5 + $0xe0] sm:$0xff] %vm1111_vm6, %v2608_v17 }
 0x172   : > { %1108 = vst.msk [vmem:[#allocation4 + $0x5] sm:$0x1] %vm1103_vm5, %v1107_v42 }
 0x173   : > { %1141 = vst.msk [vmem:[#allocation5 + $0xe8] sm:$0xff] %vm1111_vm6, %v2608_v17 }
 0x174 PF: > { %v2402_v43 = vld [vmem:[%s3354_s2 + $0x8] sm:$0xff]  ;;  %s2401_s22 = sshll.u32 %s2589_s15, 6  ;;  %v2419_v46 = vld [vmem:[%s3354_s2 + $0x10] sm:$0xff]  ;;  %v2428_v21 = vld [vmem:[%s3354_s2 + $0x18] sm:$0xff]  ;;  %vm1181_vm10 = vcmask 64512   ;;  %vm1953_vm11 = vcmask 57344  }
 0x175   : > { %v3025_v44 = vld [vmem:[#allocation4 + $0x4] ss:$0 sm:$0xff]  ;;  %2509 = vmatpush.msra.mxu1 %v2402_v43  ;;  %2510 = vmatpush.msra.mxu2 %v2402_v43  ;;  %s3031_s23 = scalar_lea.vmem [#allocation2], %s2401_s22  ;;  %v1199_v59 = vld [vmem:[#allocation5 + $0x8] sm:$0xff]  ;;  %v2446_v6 = vld [vmem:[%s3354_s2 + $0x28] sm:$0xff] }
 0x176   : > { %v1145_v4 = vld [vmem:[%s3031_s23 + $0x8] sm:$0xff]  ;;  %v1147_v32 = vld [vmem:[%s3031_s23 + $0x18] sm:$0xff]  ;;  %2511 = vmatpush.msra.mxu3 %v2402_v43  ;;  %1248 = vmatpush.msra.mxu0 %v2402_v43  ;;  %v1198_v48 = vld [vmem:[%s3354_s2] sm:$0xff] }
 0x177   : > { %v1155_v30 = vmul.f32 %v3025_v44, %v1145_v4  ;;  %v1157_v47 = vmul.f32 %v3025_v44, %v1147_v32  ;;  %1388 = vmatpush.msrb.mxu2 %v2419_v46  ;;  %v1149_v37 = vld [vmem:[%s3031_s23 + $0x28] sm:$0xff]  ;;  %1313 = vmatpush.msrb.mxu1 %v1198_v48  ;;  %v1146_v50 = vld [vmem:[%s3031_s23 + $0x10] sm:$0xff]  ;;  %v1148_v51 = vld [vmem:[%s3031_s23 + $0x20] sm:$0xff] }
 0x178   : > { %v1159_v49 = vmul.f32 %v3025_v44, %v1149_v37  ;;  %1471 = vmatpush.msrb.mxu3 %v2428_v21  ;;  %v1156_v52 = vmul.f32 %v3025_v44, %v1146_v50  ;;  %v1158_v18 = vmul.f32 %v3025_v44, %v1148_v51  ;;  %2403 = vmatmul.msk.f32.vlgmr.msra.gmra.mxu0 %vm1181_vm10, %v1199_v59  ;;  %v1150_v53 = vld [vmem:[%s3031_s23 + $0x30] sm:$0xff]  ;;  %v2437_v23 = vld [vmem:[%s3354_s2 + $0x20] sm:$0xff]  ;;  %v2464_v9 = vld [vmem:[%s3354_s2 + $0x38] sm:$0xff] }
 0x179   : > { %v3027_v45 = vld [vmem:[#allocation4 + $0x5] ss:$0 sm:$0xff]  ;;  %v1160_v55 = vmul.f32 %v3025_v44, %v1150_v53  ;;  %1554 = vmatpush.msrb.mxu0 %v2437_v23  ;;  %v2455_v7 = vld [vmem:[%s3354_s2 + $0x30] sm:$0xff]  ;;  %v1151_v35 = vld [vmem:[%s3031_s23 + $0x38] sm:$0xff] }
 0x17a   : > { %v1165_v20 = vadd.f32 %v3027_v45, %v1155_v30  ;;  %v1167_v39 = vadd.f32 %v3027_v45, %v1157_v47  ;;  %v1169_v54 = vadd.f32 %v3027_v45, %v1159_v49  ;;  %v1144_v36 = vld [vmem:[%s3031_s23] sm:$0xff]  ;;  %v1166_v62 = vadd.f32 %v3027_v45, %v1156_v52  ;;  %v1190_v15 = vld [vmem:[#allocation5 + $0x7] sm:$0xff]  ;;  %s3240_s23 = scalar_lea.vmem [#allocation3], %s2401_s22 }
 0x17b   : > { %v1168_v63 = vadd.f32 %v3027_v45, %v1158_v18  ;;  %v1170_v0 = vadd.f32 %v3027_v45, %v1160_v55  ;;  %v1154_v1 = vmul.f32 %v3025_v44, %v1144_v36  ;;  %v2473_v5 = vld [vmem:[%s3354_s2 + $0x40] sm:$0xff]  ;;  %v1339_v17 = vld [vmem:[#allocation5 + $0x9] sm:$0xff]  ;;  %v1161_v26 = vmul.f32 %v3025_v44, %v1151_v35  ;;  %v1845_v21 = vld [vmem:[#allocation5 + $0xe1] sm:$0xff] }
 0x17c   : > { %v1173_v57 = vmax.f32 %v1165_v20, 0.0  ;;  %v1175_v58 = vmax.f32 %v1167_v39, 0.0  ;;  %v1177_v25 = vmax.f32 %v1169_v54, 0.0  ;;  %v1174_v2 = vmax.f32 %v1166_v62, 0.0  ;;  %1887 = vmatpush.msra.mxu0 %v2473_v5  ;;  %v1679_v51 = vld [vmem:[#allocation5 + $0xdf] sm:$0xff] }
 0x17d   : > { %v1176_v56 = vmax.f32 %v1168_v63, 0.0  ;;  %v1178_v3 = vmax.f32 %v1170_v0, 0.0  ;;  %v1164_v24 = vadd.f32 %v3027_v45, %v1154_v1  ;;  %v1171_v14 = vadd.f32 %v3027_v45, %v1161_v26  ;;  %v1762_v59 = vld [vmem:[#allocation5 + $0xe0] sm:$0xff] }
 0x17e   : > { %1183 = vst.msk [vmem:[#allocation5 + $0x38] sm:$0xff] %vm1181_vm10, %v1173_v57 }
 0x17f   : > { %1185 = vst.msk [vmem:[#allocation5 + $0x68] sm:$0xff] %vm1181_vm10, %v1175_v58  ;;  %v1172_v22 = vmax.f32 %v1164_v24, 0.0  ;;  %v1179_v16 = vmax.f32 %v1171_v14, 0.0 }
 0x180   : > { %1187 = vst.msk [vmem:[#allocation5 + $0x98] sm:$0xff] %vm1181_vm10, %v1177_v25 }
 0x181   : > { %1184 = vst.msk [vmem:[#allocation5 + $0x50] sm:$0xff] %vm1181_vm10, %v1174_v2 }
 0x182   : > { %1186 = vst.msk [vmem:[#allocation5 + $0x80] sm:$0xff] %vm1181_vm10, %v1176_v56 }
 0x183   : > { %1188 = vst.msk [vmem:[#allocation5 + $0xb0] sm:$0xff] %vm1181_vm10, %v1178_v3 }
 0x184   : > { %1182 = vst.msk [vmem:[#allocation5 + $0x20] sm:$0xff] %vm1181_vm10, %v1172_v22 }
 0x185   : > { %v3080_v27 = vld [vmem:[#allocation5 + $0x38] sm:$0xff]  ;;  %1189 = vst.msk [vmem:[#allocation5 + $0xc8] sm:$0xff] %vm1181_vm10, %v1179_v16 }
 0x186   : > { %2405 = vmatmul.msk.f32.vlgmr.msra.gmra.mxu1 %vm1181_vm10, %v3080_v27  ;;  %v3087_v8 = vld [vmem:[#allocation5 + $0x68] sm:$0xff]  ;;  %v1423_v28 = vld [vmem:[#allocation5 + $0x37] sm:$0xff] }
 0x187   : > { %2407 = vmatmul.msk.f32.vlgmr.msra.gmra.mxu2 %vm1181_vm10, %v3087_v8  ;;  %v3094_v10 = vld [vmem:[#allocation5 + $0x98] sm:$0xff]  ;;  %1637 = vmatpush.msra.mxu1 %v2446_v6  ;;  %v1425_v38 = vld [vmem:[#allocation5 + $0x67] sm:$0xff] }
 0x188   : > { %2409 = vmatmul.msk.f32.vlgmr.msra.gmra.mxu3 %vm1181_vm10, %v3094_v10  ;;  %1721 = vmatpush.msra.mxu2 %v2455_v7  ;;  %v3098_v11 = vld [vmem:[#allocation5 + $0x50] sm:$0xff]  ;;  %v1341_v60 = vld [vmem:[#allocation5 + $0x39] sm:$0xff] }
 0x189   : > { %1804 = vmatpush.msra.mxu3 %v2464_v9  ;;  %v3100_v29 = vld [vmem:[#allocation5 + $0x80] sm:$0xff]  ;;  %v1424_v31 = vld [vmem:[#allocation5 + $0x4f] sm:$0xff]  ;;  %v1427_v42 = vld [vmem:[#allocation5 + $0x97] sm:$0xff] }
 0x18a   : > { %v3103_v13 = vld [vmem:[#allocation5 + $0xb0] sm:$0xff]  ;;  %v1426_v33 = vld [vmem:[#allocation5 + $0x7f] sm:$0xff] }
 0x18b   : > { %v1200_v12 = vld [vmem:[#allocation5 + $0x20] sm:$0xff]  ;;  %v1342_v19 = vld [vmem:[#allocation5 + $0x51] sm:$0xff]  ;;  %v1343_v40 = vld [vmem:[#allocation5 + $0x69] sm:$0xff] }
 0x18c   : > { %2404 = vmatmul.msk.f32.gmra.mxu0 %vm1181_vm10, %v1200_v12  ;;  %v1422_v34 = vld [vmem:[#allocation5 + $0x1f] sm:$0xff]  ;;  %v1428_v44 = vld [vmem:[#allocation5 + $0xaf] sm:$0xff]  ;;  %v1429_v32 = vld [vmem:[#allocation5 + $0xc7] sm:$0xff] }
 0x18d   : > { %v1340_v61 = vld [vmem:[#allocation5 + $0x21] sm:$0xff]  ;;  %v1345_v43 = vld [vmem:[#allocation5 + $0x99] sm:$0xff]  ;;  %v1346_v4 = vld [vmem:[#allocation5 + $0xb1] sm:$0xff] }
 0x18e   : > { %2406 = vmatmul.msk.f32.gmra.mxu1 %vm1181_vm10, %v3098_v11  ;;  %v1344_v41 = vld [vmem:[#allocation5 + $0x81] sm:$0xff]  ;;  %v1595_v47 = vld [vmem:[#allocation5 + $0xc9] sm:$0xff] }
 0x18f   : > { %2408 = vmatmul.msk.f32.gmra.mxu2 %vm1181_vm10, %v3100_v29  ;;  %v1512_v45 = vld [vmem:[#allocation5 + $0xc8] sm:$0xff] }
 0x190   : > { %2410 = vmatmul.msk.f32.gmra.mxu3 %vm1181_vm10, %v3103_v13 }
 0x194   : > { %2438 = vmatmul.msk.f32.vlgmr.msrb.gmra.mxu0 %vm1181_vm10, %v1200_v12 }
 0x196   : > { %2411 = vmatmul.msk.f32.vlgmr.msrb.gmra.mxu1 %vm1181_vm10, %v1190_v15 }
 0x197   : > { %2420 = vmatmul.msk.f32.vlgmr.msrb.gmra.mxu2 %vm1181_vm10, %v1339_v17 }
 0x198   : > { %2429 = vmatmul.msk.f32.vlgmr.msrb.gmra.mxu3 %vm1181_vm10, %v1422_v34 }
 0x19c   : > { %2439 = vmatmul.msk.f32.gmra.mxu0 %vm1181_vm10, %v3080_v27 }
 0x19e   : > { %2412 = vmatmul.msk.f32.gmra.mxu1 %vm1181_vm10, %v1422_v34 }
 0x19f   : > { %2421 = vmatmul.msk.f32.gmra.mxu2 %vm1181_vm10, %v1340_v61 }
 0x1a0   : > { %2430 = vmatmul.msk.f32.gmra.mxu3 %vm1181_vm10, %v1423_v28 }
 0x1a4   : > { %2440 = vmatmul.msk.f32.gmra.mxu0 %vm1181_vm10, %v3098_v11 }
 0x1a6   : > { %2413 = vmatmul.msk.f32.gmra.mxu1 %vm1181_vm10, %v1423_v28 }
 0x1a7   : > { %2422 = vmatmul.msk.f32.gmra.mxu2 %vm1181_vm10, %v1341_v60 }
 0x1a8   : > { %2431 = vmatmul.msk.f32.gmra.mxu3 %vm1181_vm10, %v1424_v31 }
 0x1ac   : > { %2441 = vmatmul.msk.f32.gmra.mxu0 %vm1181_vm10, %v3087_v8 }
 0x1ae   : > { %2414 = vmatmul.msk.f32.gmra.mxu1 %vm1181_vm10, %v1424_v31 }
 0x1af   : > { %2423 = vmatmul.msk.f32.gmra.mxu2 %vm1181_vm10, %v1342_v19 }
 0x1b0   : > { %2432 = vmatmul.msk.f32.gmra.mxu3 %vm1181_vm10, %v1425_v38 }
 0x1b4   : > { %2442 = vmatmul.msk.f32.gmra.mxu0 %vm1181_vm10, %v3100_v29 }
 0x1b6   : > { %2415 = vmatmul.msk.f32.gmra.mxu1 %vm1181_vm10, %v1425_v38 }
 0x1b7   : > { %2424 = vmatmul.msk.f32.gmra.mxu2 %vm1181_vm10, %v1343_v40 }
 0x1b8   : > { %2433 = vmatmul.msk.f32.gmra.mxu3 %vm1181_vm10, %v1426_v33 }
 0x1bc   : > { %2443 = vmatmul.msk.f32.gmra.mxu0 %vm1181_vm10, %v3094_v10 }
 0x1be   : > { %2416 = vmatmul.msk.f32.gmra.mxu1 %vm1181_vm10, %v1426_v33 }
 0x1bf   : > { %2425 = vmatmul.msk.f32.gmra.mxu2 %vm1181_vm10, %v1344_v41 }
 0x1c0   : > { %2434 = vmatmul.msk.f32.gmra.mxu3 %vm1181_vm10, %v1427_v42 }
 0x1c4   : > { %2444 = vmatmul.msk.f32.gmra.mxu0 %vm1181_vm10, %v3103_v13 }
 0x1c6   : > { %2417 = vmatmul.msk.f32.gmra.mxu1 %vm1181_vm10, %v1427_v42 }
 0x1c7   : > { %2426 = vmatmul.msk.f32.gmra.mxu2 %vm1181_vm10, %v1345_v43 }
 0x1c8   : > { %2435 = vmatmul.msk.f32.gmra.mxu3 %vm1181_vm10, %v1428_v44 }
 0x1cc   : > { %2445 = vmatmul.msk.f32.gmra.mxu0 %vm1181_vm10, %v1512_v45 }
 0x1ce   : > { %2418 = vmatmul.msk.f32.gmra.mxu1 %vm1181_vm10, %v1428_v44 }
 0x1cf   : > { %2427 = vmatmul.msk.f32.gmra.mxu2 %vm1181_vm10, %v1346_v4 }
 0x1d0   : > { %2436 = vmatmul.msk.f32.gmra.mxu3 %vm1181_vm10, %v1429_v32 }
 0x1d4   : > { %2474 = vmatmul.msk.f32.vlgmr.msra.gmra.mxu0 %vm1181_vm10, %v1341_v60 }
 0x1d6   : > { %2447 = vmatmul.msk.f32.vlgmr.msra.gmra.mxu1 %vm1181_vm10, %v1340_v61 }
 0x1d7   : > { %2456 = vmatmul.msk.f32.vlgmr.msra.gmra.mxu2 %vm1181_vm10, %v1423_v28 }
 0x1d8   : > { %2465 = vmatmul.msk.f32.vlgmr.msra.gmra.mxu3 %vm1181_vm10, %v3080_v27 }
 0x1dc   : > { %2475 = vmatmul.msk.f32.gmra.mxu0 %vm1181_vm10, %v1342_v19 }
 0x1de   : > { %2448 = vmatmul.msk.f32.gmra.mxu1 %vm1181_vm10, %v1341_v60 }
 0x1df   : > { %2457 = vmatmul.msk.f32.gmra.mxu2 %vm1181_vm10, %v1424_v31 }
 0x1e0   : > { %2466 = vmatmul.msk.f32.gmra.mxu3 %vm1181_vm10, %v3098_v11 }
 0x1e4   : > { %2476 = vmatmul.msk.f32.gmra.mxu0 %vm1181_vm10, %v1343_v40 }
 0x1e6   : > { %2449 = vmatmul.msk.f32.gmra.mxu1 %vm1181_vm10, %v1342_v19 }
 0x1e7   : > { %2458 = vmatmul.msk.f32.gmra.mxu2 %vm1181_vm10, %v1425_v38 }
 0x1e8   : > { %2467 = vmatmul.msk.f32.gmra.mxu3 %vm1181_vm10, %v3087_v8 }
 0x1ec   : > { %2477 = vmatmul.msk.f32.gmra.mxu0 %vm1181_vm10, %v1344_v41 }
 0x1ee   : > { %2450 = vmatmul.msk.f32.gmra.mxu1 %vm1181_vm10, %v1343_v40 }
 0x1ef   : > { %2459 = vmatmul.msk.f32.gmra.mxu2 %vm1181_vm10, %v1426_v33 }
 0x1f0   : > { %2468 = vmatmul.msk.f32.gmra.mxu3 %vm1181_vm10, %v3100_v29 }
 0x1f4   : > { %2478 = vmatmul.msk.f32.gmra.mxu0 %vm1181_vm10, %v1345_v43 }
 0x1f5   : > { %v1250_v46 = vpop.f32.mrf.mxu0 }
 0x1f6   : > { %2451 = vmatmul.msk.f32.gmra.mxu1 %vm1181_vm10, %v1344_v41 }
 0x1f7   : > { %2460 = vmatmul.msk.f32.gmra.mxu2 %vm1181_vm10, %v1427_v42 }
 0x1f8   : > { %2469 = vmatmul.msk.f32.gmra.mxu3 %vm1181_vm10, %v3094_v10 }
 0x1fc   : > { %2479 = vmatmul.msk.f32.gmra.mxu0 %vm1181_vm10, %v1346_v4 }
 0x1fe   : > { %2452 = vmatmul.msk.f32.gmra.mxu1 %vm1181_vm10, %v1345_v43 }
 0x1ff   : > { %2461 = vmatmul.msk.f32.gmra.mxu2 %vm1181_vm10, %v1428_v44 }
 0x200   : > { %2470 = vmatmul.msk.f32.gmra.mxu3 %vm1181_vm10, %v3103_v13 }
 0x203   : > { %v3183_v30 = vpop.f32.mrf.mxu1 }
 0x204   : > { %2480 = vmatmul.msk.f32.gmra.mxu0 %vm1181_vm10, %v1595_v47 }
 0x206   : > { %2453 = vmatmul.msk.f32.gmra.mxu1 %vm1181_vm10, %v1346_v4 }
 0x207   : > { %2462 = vmatmul.msk.f32.gmra.mxu2 %vm1181_vm10, %v1429_v32 }
 0x208   : > { %2471 = vmatmul.msk.f32.gmra.mxu3 %vm1181_vm10, %v1512_v45 }
 0x209   : > { %v1253_v37 = vpop.f32.mrf.mxu0 }
 0x20a   : > { %v3189_v48 = vpop.f32.mrf.mxu2 }
 0x20b   : > { %v3191_v49 = vpop.f32.mrf.mxu1  ;;  %v3193_v50 = vpop.f32.mrf.mxu3 }
 0x20c   : > { %2481 = vmatmul.msk.f32.gmra.mxu0 %vm1181_vm10, %v1845_v21 }
 0x20e   : > { %2454 = vmatmul.msk.f32.gmra.mxu1 %vm1181_vm10, %v1595_v47 }
 0x20f   : > { %2463 = vmatmul.msk.f32.gmra.mxu2 %vm1181_vm10, %v1679_v51 }
 0x210   : > { %2472 = vmatmul.msk.f32.gmra.mxu3 %vm1181_vm10, %v1762_v59 }
 0x211   : > { %v1556_v20 = vpop.f32.mrf.mxu0 }
 0x212   : > { %v3199_v39 = vpop.f32.mrf.mxu2 }
 0x213   : > { %v3201_v52 = vpop.f32.mrf.mxu3  ;;  %v1315_v18 = vpop.f32.mrf.mxu1 }
 0x214   : > { %v1316_v15 = vadd.f32 %v1315_v18, %v1250_v46 }
 0x219   : > { %v1559_v53 = vpop.f32.mrf.mxu0 }
 0x21a   : > { %v1390_v23 = vpop.f32.mrf.mxu2 }
 0x21b   : > { %v1318_v54 = vpop.f32.mrf.mxu1  ;;  %v1473_v55 = vpop.f32.mrf.mxu3  ;;  %v1414_v17 = vadd.f32 %v1390_v23, %v1316_v15 }
 0x21c   : > { %v1319_v60 = vadd.f32 %v1318_v54, %v1253_v37 }
 0x21d   : > { %v1497_v28 = vadd.f32 %v1473_v55, %v1414_v17 }
 0x21f   : > { %v1580_v31 = vadd.f32 %v1556_v20, %v1497_v28 }
 0x221   : > { %v1562_v36 = vpop.f32.mrf.mxu0 }
 0x222   : > { %v1393_v57 = vpop.f32.mrf.mxu2 }
 0x223   : > { %v1321_v58 = vpop.f32.mrf.mxu1  ;;  %v1476_v62 = vpop.f32.mrf.mxu3  ;;  %v1415_v14 = vadd.f32 %v1393_v57, %v1319_v60 }
 0x224   : > { %v1322_v43 = vadd.f32 %v1321_v58, %v3183_v30 }
 0x225   : > { %v1498_v40 = vadd.f32 %v1476_v62, %v1415_v14 }
 0x227   : > { %v1581_v45 = vadd.f32 %v1559_v53, %v1498_v40 }
 0x229   : > { %v3203_v63 = vpop.f32.mrf.mxu0 }
 0x22a   : > { %v1396_v25 = vpop.f32.mrf.mxu2 }
 0x22b   : > { %v1324_v0 = vpop.f32.mrf.mxu1  ;;  %v1479_v1 = vpop.f32.mrf.mxu3  ;;  %v1416_v4 = vadd.f32 %v1396_v25, %v1322_v43 }
 0x22c   : > { %v1325_v30 = vadd.f32 %v1324_v0, %v3191_v49 }
 0x22d   : > { %v1499_v21 = vadd.f32 %v1479_v1, %v1416_v4 }
 0x22f   : > { %v1582_v53 = vadd.f32 %v1562_v36, %v1499_v21 }
 0x231   : > { %v3205_v2 = vpop.f32.mrf.mxu0 }
 0x232   : > { %v1399_v56 = vpop.f32.mrf.mxu2 }
 0x233   : > { %v3207_v3 = vpop.f32.mrf.mxu1  ;;  %v1482_v24 = vpop.f32.mrf.mxu3  ;;  %v1417_v23 = vadd.f32 %v1399_v56, %v1325_v30 }
 0x234   : > { %v1328_v60 = vadd.f32 %v3207_v3, %v3189_v48 }
 0x235   : > { %v1500_v17 = vadd.f32 %v1482_v24, %v1417_v23 }
 0x237   : > { %v1583_v14 = vadd.f32 %v3203_v63, %v1500_v17 }
 0x239   : > { %v3209_v5 = vpop.f32.mrf.mxu0 }
 0x23a   : > { %v3211_v22 = vpop.f32.mrf.mxu2 }
 0x23b   : > { %v3213_v6 = vpop.f32.mrf.mxu1  ;;  %v3215_v27 = vpop.f32.mrf.mxu3 }
 0x241   : > { %v3217_v7 = vpop.f32.mrf.mxu0 }
 0x242   : > { %v3219_v8 = vpop.f32.mrf.mxu2 }
 0x243   : > { %v3221_v9 = vpop.f32.mrf.mxu1  ;;  %v3223_v10 = vpop.f32.mrf.mxu3 }
 0x249   : > { %v3225_v11 = vpop.f32.mrf.mxu0 }
 0x24a   : > { %v3227_v12 = vpop.f32.mrf.mxu2 }
 0x24b   : > { %v3229_v29 = vpop.f32.mrf.mxu1  ;;  %v3231_v13 = vpop.f32.mrf.mxu3 }
 0x251   : > { %v1889_v34 = vpop.f32.mrf.mxu0 }
 0x252   : > { %v3233_v61 = vpop.f32.mrf.mxu2 }
 0x253   : > { %v3235_v35 = vpop.f32.mrf.mxu3  ;;  %v1639_v26 = vpop.f32.mrf.mxu1 }
 0x254   : > { %v1663_v16 = vadd.f32 %v1639_v26, %v1580_v31 }
 0x259   : > { %v1892_v19 = vpop.f32.mrf.mxu0 }
 0x25a   : > { %v1723_v38 = vpop.f32.mrf.mxu2 }
 0x25b   : > { %v1747_v33 = vadd.f32 %v1723_v38, %v1663_v16  ;;  %v1642_v41 = vpop.f32.mrf.mxu1  ;;  %v1806_v42 = vpop.f32.mrf.mxu3  ;;  %v1418_v16 = vadd.f32 %v3211_v22, %v1328_v60  ;;  %v1331_v22 = vadd.f32 %v3213_v6, %v3199_v39 }
 0x25c   : > { %v1664_v46 = vadd.f32 %v1642_v41, %v1581_v45 }
 0x25d   : > { %v1830_v44 = vadd.f32 %v1806_v42, %v1747_v33  ;;  %v1501_v42 = vadd.f32 %v3215_v27, %v1418_v16 }
 0x25f   : > { %v1913_v32 = vadd.f32 %v1889_v34, %v1830_v44 }
 0x261   : > { %1922 = vst.msk [vmem:[%s3240_s23] sm:$0xff] %vm1181_vm10, %v1913_v32  ;;  %v1895_v37 = vpop.f32.mrf.mxu0  ;;  %v1956_v54 = vmul.f32 %v1913_v32, %v1913_v32  ;;  %v1931_v57 = vsel %vm1181_vm10, %v1913_v32, 0.0  ;;  %v1584_v32 = vadd.f32 %v3205_v2, %v1501_v42 }
 0x262   : > { %v1726_v47 = vpop.f32.mrf.mxu2 }
 0x263   : > { %v1748_v51 = vadd.f32 %v1726_v47, %v1664_v46  ;;  %v1645_v59 = vpop.f32.mrf.mxu1  ;;  %v1809_v20 = vpop.f32.mrf.mxu3  ;;  %v1964_v34 = vsel %vm1181_vm10, %v1956_v54, 0.0  ;;  %v1419_v46 = vadd.f32 %v3219_v8, %v1331_v22  ;;  %v1334_v8 = vadd.f32 %v3221_v9, %v3193_v50 }
 0x264   : > { %v1665_v58 = vadd.f32 %v1645_v59, %v1582_v53 }
 0x265   : > { %v1831_v18 = vadd.f32 %v1809_v20, %v1748_v51  ;;  %v1502_v20 = vadd.f32 %v3223_v10, %v1419_v46  ;;  %v1420_v54 = vadd.f32 %v3227_v12, %v1334_v8  ;;  %v1337_v12 = vadd.f32 %v3229_v29, %v3201_v52 }
 0x267   : > { %v1914_v55 = vadd.f32 %v1892_v19, %v1831_v18  ;;  %v1585_v23 = vadd.f32 %v3209_v5, %v1502_v20 }
 0x269   : > { %1923 = vst.msk [vmem:[%s3240_s23 + $0x8] sm:$0xff] %vm1181_vm10, %v1914_v55  ;;  %v1932_v62 = vsel %vm1181_vm10, %v1914_v55, 0.0  ;;  %v1957_v25 = vmul.f32 %v1914_v55, %v1914_v55  ;;  %v1898_v26 = vpop.f32.mrf.mxu0 }
 0x26a   : > { %v1933_v15 = vadd.f32 %v1932_v62, %v1931_v57  ;;  %v1729_v1 = vpop.f32.mrf.mxu2 }
 0x26b   : > { %v1965_v49 = vsel %vm1181_vm10, %v1957_v25, 0.0  ;;  %v1749_v36 = vadd.f32 %v1729_v1, %v1665_v58  ;;  %v1648_v0 = vpop.f32.mrf.mxu1  ;;  %v1812_v56 = vpop.f32.mrf.mxu3  ;;  %v1503_v1 = vadd.f32 %v3231_v13, %v1420_v54 }
 0x26c   : > { %v1966_v28 = vadd.f32 %v1965_v49, %v1964_v34  ;;  %v1666_v38 = vadd.f32 %v1648_v0, %v1583_v14  ;;  %v1421_v0 = vadd.f32 %v3233_v61, %v1337_v12 }
 0x26d   : > { %v1832_v31 = vadd.f32 %v1812_v56, %v1749_v36  ;;  %v1586_v36 = vadd.f32 %v3217_v7, %v1503_v1 }
 0x26e   : > { %v1504_v16 = vadd.f32 %v3235_v35, %v1421_v0 }
 0x26f   : > { %v1915_v19 = vadd.f32 %v1895_v37, %v1832_v31 }
 0x271   : > { %1924 = vst.msk [vmem:[%s3240_s23 + $0x10] sm:$0xff] %vm1181_vm10, %v1915_v19  ;;  %v1934_v24 = vsel %vm1181_vm10, %v1915_v19, 0.0  ;;  %v1958_v40 = vmul.f32 %v1915_v19, %v1915_v19  ;;  %v1901_v4 = vpop.f32.mrf.mxu0 }
 0x272   : > { %v1935_v33 = vadd.f32 %v1934_v24, %v1933_v15  ;;  %v1732_v41 = vpop.f32.mrf.mxu2  ;;  %v1587_v24 = vadd.f32 %v3225_v11, %v1504_v16 }
 0x273   : > { %v1967_v43 = vsel %vm1181_vm10, %v1958_v40, 0.0  ;;  %v1750_v48 = vadd.f32 %v1732_v41, %v1666_v38  ;;  %v1651_v3 = vpop.f32.mrf.mxu1  ;;  %v1815_v44 = vpop.f32.mrf.mxu3 }
 0x274   : > { %v1968_v63 = vadd.f32 %v1967_v43, %v1966_v28  ;;  %v1667_v37 = vadd.f32 %v1651_v3, %v1584_v32 }
 0x275   : > { %v1833_v45 = vadd.f32 %v1815_v44, %v1750_v48 }
 0x277   : > { %v1916_v47 = vadd.f32 %v1898_v26, %v1833_v45 }
 0x279   : > { %1925 = vst.msk [vmem:[%s3240_s23 + $0x18] sm:$0xff] %vm1181_vm10, %v1916_v47  ;;  %v1936_v27 = vsel %vm1181_vm10, %v1916_v47, 0.0  ;;  %v1959_v21 = vmul.f32 %v1916_v47, %v1916_v47  ;;  %v1904_v57 = vpop.f32.mrf.mxu0 }
 0x27a   : > { %v1937_v51 = vadd.f32 %v1936_v27, %v1935_v33  ;;  %v1735_v59 = vpop.f32.mrf.mxu2 }
 0x27b   : > { %v1969_v39 = vsel %vm1181_vm10, %v1959_v21, 0.0  ;;  %v1751_v6 = vadd.f32 %v1735_v59, %v1667_v37  ;;  %v1654_v30 = vpop.f32.mrf.mxu1  ;;  %v1818_v18 = vpop.f32.mrf.mxu3 }
 0x27c   : > { %v1970_v2 = vadd.f32 %v1969_v39, %v1968_v63  ;;  %v1668_v58 = vadd.f32 %v1654_v30, %v1585_v23  ;;  %v1955_v23 = vld [vmem:[#allocation4 + $0x3] sm:$0x1] }
 0x27d   : > { %v1834_v53 = vadd.f32 %v1818_v18, %v1751_v6 }
 0x27f   : > { %v1917_v55 = vadd.f32 %v1901_v4, %v1834_v53 }
 0x281   : > { %1926 = vst.msk [vmem:[%s3240_s23 + $0x20] sm:$0xff] %vm1181_vm10, %v1917_v55  ;;  %v1938_v10 = vsel %vm1181_vm10, %v1917_v55, 0.0  ;;  %v1960_v62 = vmul.f32 %v1917_v55, %v1917_v55  ;;  %v1907_v14 = vpop.f32.mrf.mxu0 }
 0x282   : > { %v1939_v25 = vadd.f32 %v1938_v10, %v1937_v51  ;;  %v1738_v15 = vpop.f32.mrf.mxu2 }
 0x283   : > { %v1971_v50 = vsel %vm1181_vm10, %v1960_v62, 0.0  ;;  %v1752_v9 = vadd.f32 %v1738_v15, %v1668_v58  ;;  %v1821_v17 = vpop.f32.mrf.mxu3  ;;  %v1657_v34 = vpop.f32.mrf.mxu1 }
 0x284   : > { %v1972_v5 = vadd.f32 %v1971_v50, %v1970_v2  ;;  %v1669_v28 = vadd.f32 %v1657_v34, %v1586_v36  ;;  %v1930_v2 = vld [vmem:[#allocation4 + $0x2] sm:$0x1] }
 0x285   : > { %v1835_v49 = vadd.f32 %v1821_v17, %v1752_v9 }
 0x287   : > { %v1918_v56 = vadd.f32 %v1904_v57, %v1835_v49 }
 0x289   : > { %1927 = vst.msk [vmem:[%s3240_s23 + $0x28] sm:$0xff] %vm1181_vm10, %v1918_v56  ;;  %v1940_v13 = vsel %vm1181_vm10, %v1918_v56, 0.0  ;;  %v1961_v26 = vmul.f32 %v1918_v56, %v1918_v56  ;;  %v1910_v22 = vpop.f32.mrf.mxu0 }
 0x28a   : > { %v1941_v60 = vadd.f32 %v1940_v13, %v1939_v25  ;;  %v1741_v31 = vpop.f32.mrf.mxu2 }
 0x28b   : > { %v1973_v52 = vsel %vm1181_vm10, %v1961_v26, 0.0  ;;  %v1753_v29 = vadd.f32 %v1741_v31, %v1669_v28  ;;  %v1824_v19 = vpop.f32.mrf.mxu3  ;;  %v1660_v61 = vpop.f32.mrf.mxu1 }
 0x28c   : > { %v1974_v7 = vadd.f32 %v1973_v52, %v1972_v5  ;;  %v1670_v33 = vadd.f32 %v1660_v61, %v1587_v24 }
 0x28d   : > { %v1836_v38 = vadd.f32 %v1824_v19, %v1753_v29 }
 0x28f   : > { %v1919_v40 = vadd.f32 %v1907_v14, %v1836_v38 }
 0x291   : > { %1928 = vst.msk [vmem:[%s3240_s23 + $0x30] sm:$0xff] %vm1181_vm10, %v1919_v40  ;;  %v1942_v41 = vsel %vm1181_vm10, %v1919_v40, 0.0  ;;  %v1962_v42 = vmul.f32 %v1919_v40, %v1919_v40 }
 0x292   : > { %v1943_v43 = vadd.f32 %v1942_v41, %v1941_v60  ;;  %v1744_v48 = vpop.f32.mrf.mxu2 }
 0x293   : > { %v1975_v35 = vsel %vm1181_vm10, %v1962_v42, 0.0  ;;  %v1754_v3 = vadd.f32 %v1744_v48, %v1670_v33  ;;  %v1827_v44 = vpop.f32.mrf.mxu3 }
 0x294   : > { %v1976_v63 = vadd.f32 %v1975_v35, %v1974_v7 }
 0x295   : > { %v1837_v45 = vadd.f32 %v1827_v44, %v1754_v3 }
 0x297   : > { %v1920_v4 = vadd.f32 %v1910_v22, %v1837_v45 }
 0x299   : > { %1929 = vst.msk [vmem:[%s3240_s23 + $0x38] sm:$0xff] %vm1181_vm10, %v1920_v4  ;;  %v1944_v11 = vsel %vm1181_vm10, %v1920_v4, 0.0  ;;  %v1963_v32 = vmul.f32 %v1920_v4, %v1920_v4 }
 0x29a   : > { %v1945_v46 = vadd.f32 %v1944_v11, %v1943_v43 }
 0x29b   : > { %v1977_v47 = vsel %vm1181_vm10, %v1963_v32, 0.0 }
 0x29c   : > { %v1946_v37 = vrot.slane %v1945_v46, 4  ;;  %v1978_v27 = vadd.f32 %v1977_v47, %v1976_v63 }
 0x29e   : > { %v1947_v21 = vadd.f32 %v1946_v37, %v1945_v46  ;;  %v1979_v51 = vrot.slane %v1978_v27, 4 }
 0x2a0   : > { %v1948_v59 = vrot.slane %v1947_v21, 2  ;;  %v1980_v20 = vadd.f32 %v1979_v51, %v1978_v27 }
 0x2a2   : > { %v1949_v39 = vadd.f32 %v1948_v59, %v1947_v21  ;;  %v1981_v6 = vrot.slane %v1980_v20, 2 }
 0x2a4   : > { %v1950_v30 = vrot.slane %v1949_v39, 1  ;;  %v1982_v18 = vadd.f32 %v1981_v6, %v1980_v20 }
 0x2a6   : > { %v1951_v8 = vadd.f32 %v1950_v30, %v1949_v39  ;;  %v1983_v53 = vrot.slane %v1982_v18, 1 }
 0x2a8   : > { %v1952_v54 = vadd.f32 %v1951_v8, %v1930_v2  ;;  %v1984_v55 = vadd.f32 %v1983_v53, %v1982_v18 }
 0x2aa   : > { %1954 = vst.msk [vmem:[#allocation4 + $0x2] sm:$0x1] %vm1953_vm11, %v1952_v54  ;;  %v1985_v57 = vadd.f32 %v1984_v55, %v1955_v23 }
 0x2ac   : > { %1986 = vst.msk [vmem:[#allocation4 + $0x3] sm:$0x1] %vm1953_vm11, %v1985_v57 }
 0x2ad PF: > { %p2482_p13 = scmp.ne.s32.totalorder %s2593_s16, 2 }
 0x2ae   : > { %p2483_p0 = scmp.ne.s32.totalorder (!%p2482_p13), %s2589_s15, 0 }
 0x2af   : > { %1990 = sbr.rel (%p2482_p13) target bundleno = 886 (0x376), region = 56 }
 0x2b4   : > { %1994 = sbr.rel (%p2483_p0) target bundleno = 731 (0x2db), region = 60 }
 0x2b9   : > { %v1995_v58 = vld [vmem:[#allocation4 + $0x2] sm:$0x1]  ;;  %v1997_v10 = vld [vmem:[#allocation4 + $0x3] sm:$0x1]  ;;  %vm2014_vm15 = vcmask 57344  }
 0x2ba   : > { %v1996_v62 = vmul.f32 0.0078125, %v1995_v58  ;;  %v1998_v25 = vmul.f32 0.0078125, %v1997_v10  ;;  %v2001_v49 = vld [vmem:[%s3355_s3 + $0x2] sm:$0x1]  ;;  %v2016_v28 = vld [vmem:[%s3355_s3 + $0x3] sm:$0x1] }
 0x2bc   : > { %v1999_v15 = vmul.f32 %v1996_v62, %v1996_v62 }
 0x2be   : > { %v2000_v1 = vsub.f32 %v1998_v25, %v1999_v15 }
 0x2c0   : > { %v2002_v50 = vadd.f32 1e-05, %v2000_v1 }
 0x2c2   : > { %2563 = vrsqrt.f32 %v2002_v50  ;;  %vm2009_vm12 = vweird.f32 %v2002_v50 }
 0x2c8   : > { %v2564_v9 = vpop.eup %2563 }
 0x2c9   : > { %v2004_v17 = vmul.f32 %v2564_v9, %v2002_v50  ;;  %vm2010_vm13 = vweird.f32 %v2564_v9 }
 0x2ca   : > { %vm2011_vm14 = vmor %vm2009_vm12, %vm2010_vm13 }
 0x2cb   : > { %v2005_v5 = vmul.f32 %v2564_v9, %v2004_v17 }
 0x2cd   : > { %v2006_v34 = vmul.f32 0.5, %v2005_v5 }
 0x2cf   : > { %v2007_v12 = vsub.f32 1.5, %v2006_v34 }
 0x2d1   : > { %v2008_v36 = vmul.f32 %v2564_v9, %v2007_v12 }
 0x2d3   : > { %v2012_v0 = vsel %vm2011_vm14, %v2564_v9, %v2008_v36 }
 0x2d4   : > { %v2013_v56 = vmul.f32 %v2012_v0, %v2001_v49 }
 0x2d6   : > { %2015 = vst.msk [vmem:[#allocation4 + $0x6] sm:$0x1] %vm2014_vm15, %v2013_v56  ;;  %v2017_v13 = vmul.f32 %v2013_v56, %v1996_v62 }
 0x2d8   : > { %v2018_v26 = vsub.f32 %v2016_v28, %v2017_v13 }
 0x2da   : > { %2019 = vst.msk [vmem:[#allocation4 + $0x7] sm:$0x1] %vm2014_vm15, %v2018_v26 }
 0x2db PF: > { %v2059_v60 = vlaneseq  ;;  %vm2092_vm0 = vcmask 1043456   ;;  %v2489_v52 = vld [vmem:[%s2676_s28 + $0x1f0] sm:$0xff]  ;;  %vm2067_vm2 = vcmask 31744   ;;  %v2609_v19 = vmov 0.0   ;;  %v2490_v24 = vld [vmem:[%s2676_s28 + $0x200] sm:$0xff]  ;;  %s2484_s27 = sshll.u32 %s2589_s15, 6 }
 0x2dc   : > { %v2491_v29 = vld [vmem:[%s2676_s28 + $0x210] sm:$0xff]  ;;  %v2492_v40 = vld [vmem:[%s2676_s28 + $0x220] sm:$0xff]  ;;  %s2021_s29 = scalar_lea.vmem [#allocation3], %s2484_s27  ;;  %vm2153_vm3 = vcmask 64512  }
 0x2dd   : > { %v2060_v31 = vshrl.u32 %v2059_v60, 7  ;;  %v2062_v14 = vand.u32 127, %v2059_v60  ;;  %v2485_v38 = vld [vmem:[%s2676_s28 + $0x1b0] sm:$0xff]  ;;  %v2486_v33 = vld [vmem:[%s2676_s28 + $0x1c0] sm:$0xff]  ;;  %v2023_v46 = vld [vmem:[%s2021_s29 + $0x8] sm:$0xff] }
 0x2de   : > { %v2487_v61 = vld [vmem:[%s2676_s28 + $0x1d0] sm:$0xff]  ;;  %v2488_v41 = vld [vmem:[%s2676_s28 + $0x1e0] sm:$0xff]  ;;  %v2025_v47 = vld [vmem:[%s2021_s29 + $0x18] sm:$0xff] }
 0x2df   : > { %v2063_v16 = vadd.s32 2, %v2060_v31  ;;  %v2565_v42 = vld [vmem:[#allocation4 + $0x6] ss:$0 sm:$0xff]  ;;  %v2024_v48 = vld [vmem:[%s2021_s29 + $0x10] sm:$0xff]  ;;  %v2027_v30 = vld [vmem:[%s2021_s29 + $0x28] sm:$0xff] }
 0x2e0   : > { %v2022_v43 = vld [vmem:[%s2021_s29] sm:$0xff]  ;;  %v2034_v44 = vmul.f32 %v2565_v42, %v2024_v48  ;;  %v2028_v22 = vld [vmem:[%s2021_s29 + $0x30] sm:$0xff]  ;;  %v2033_v39 = vmul.f32 %v2565_v42, %v2023_v46  ;;  %v2035_v6 = vmul.f32 %v2565_v42, %v2025_v47  ;;  %v2029_v18 = vld [vmem:[%s2021_s29 + $0x38] sm:$0xff]  ;;  %v2037_v54 = vmul.f32 %v2565_v42, %v2027_v30 }
 0x2e1   : > { %vm2064_vm1 = vcmp.eq.s32.totalorder %v2062_v14, %v2063_v16  ;;  %v2032_v35 = vmul.f32 %v2565_v42, %v2022_v43  ;;  %v2566_v3 = vld [vmem:[#allocation4 + $0x7] ss:$0 sm:$0xff]  ;;  %v2038_v4 = vmul.f32 %v2565_v42, %v2028_v22  ;;  %v2039_v55 = vmul.f32 %v2565_v42, %v2029_v18 }
 0x2e2   : > { %v2493_v7 = vsel %vm2064_vm1, 1.0, %v2609_v19  ;;  %v2026_v63 = vld [vmem:[%s2021_s29 + $0x20] sm:$0xff]  ;;  %v2044_v32 = vadd.f32 %v2566_v3, %v2034_v44  ;;  %v2043_v10 = vadd.f32 %v2566_v3, %v2033_v39  ;;  %v2045_v62 = vadd.f32 %v2566_v3, %v2035_v6 }
 0x2e3   : > { %2513 = vmatpush.msk.msra.mxu2 %vm2092_vm0, %v2493_v7  ;;  %2514 = vmatpush.msk.msra.mxu3 %vm2092_vm0, %v2493_v7  ;;  %v2036_v45 = vmul.f32 %v2565_v42, %v2026_v63  ;;  %v2042_v11 = vadd.f32 %v2566_v3, %v2032_v35  ;;  %v2048_v51 = vadd.f32 %v2566_v3, %v2038_v4 }
 0x2e4   : > { %2499 = vmatmul.msk.f32.vlgmr.msra.gmra.mxu2 %vm2067_vm2, %v2489_v52  ;;  %2501 = vmatmul.msk.f32.vlgmr.msra.gmra.mxu3 %vm2067_vm2, %v2491_v29  ;;  %v2047_v5 = vadd.f32 %v2566_v3, %v2037_v54  ;;  %v2049_v34 = vadd.f32 %v2566_v3, %v2039_v55 }
 0x2e5   : > { %2494 = vmatpush.msk.msra.mxu0 %vm2092_vm0, %v2493_v7  ;;  %2512 = vmatpush.msk.msra.mxu1 %vm2092_vm0, %v2493_v7  ;;  %v2046_v21 = vadd.f32 %v2566_v3, %v2036_v45 }
 0x2e6   : > { %2495 = vmatmul.msk.f32.vlgmr.msra.gmra.mxu0 %vm2067_vm2, %v2485_v38  ;;  %2497 = vmatmul.msk.f32.vlgmr.msra.gmra.mxu1 %vm2067_vm2, %v2487_v61 }
 0x2ec   : > { %2500 = vmatmul.msk.f32.gmra.mxu2 %vm2067_vm2, %v2490_v24  ;;  %2502 = vmatmul.msk.f32.gmra.mxu3 %vm2067_vm2, %v2492_v40 }
 0x2ee   : > { %2496 = vmatmul.msk.f32.gmra.mxu0 %vm2067_vm2, %v2486_v33  ;;  %2498 = vmatmul.msk.f32.gmra.mxu1 %vm2067_vm2, %v2488_v41 }
 0x363   : > { %v2113_v37 = vpop.f32.mrf.mxu0  ;;  %v2119_v27 = vpop.f32.mrf.mxu1 }
 0x364   : > { %v2137_v59 = vadd.f32 %v2113_v37, %v2042_v11  ;;  %v2139_v20 = vadd.f32 %v2119_v27, %v2044_v32 }
 0x366   : > { %v2145_v2 = vmax.f32 %v2137_v59, 0.0  ;;  %v2147_v8 = vmax.f32 %v2139_v20, 0.0 }
 0x367   : > { %v2125_v53 = vpop.f32.mrf.mxu2  ;;  %v2131_v23 = vpop.f32.mrf.mxu3 }
 0x368   : > { %2154 = vst.msk [vmem:[%s2681_s5] sm:$0xff] %vm2153_vm3, %v2145_v2  ;;  %v2141_v57 = vadd.f32 %v2125_v53, %v2046_v21  ;;  %v2143_v58 = vadd.f32 %v2131_v23, %v2048_v51 }
 0x369   : > { %2156 = vst.msk [vmem:[%s2681_s5 + $0x10] sm:$0xff] %vm2153_vm3, %v2147_v8 }
 0x36a   : > { %v2149_v25 = vmax.f32 %v2141_v57, 0.0  ;;  %v2151_v15 = vmax.f32 %v2143_v58, 0.0 }
 0x36b   : > { %v2116_v1 = vpop.f32.mrf.mxu0  ;;  %v2122_v50 = vpop.f32.mrf.mxu1 }
 0x36c   : > { %2158 = vst.msk [vmem:[%s2681_s5 + $0x20] sm:$0xff] %vm2153_vm3, %v2149_v25  ;;  %v2138_v9 = vadd.f32 %v2116_v1, %v2043_v10  ;;  %v2140_v17 = vadd.f32 %v2122_v50, %v2045_v62 }
 0x36d   : > { %2160 = vst.msk [vmem:[%s2681_s5 + $0x30] sm:$0xff] %vm2153_vm3, %v2151_v15 }
 0x36e   : > { %v2146_v12 = vmax.f32 %v2138_v9, 0.0  ;;  %v2148_v49 = vmax.f32 %v2140_v17, 0.0 }
 0x36f   : > { %v2128_v36 = vpop.f32.mrf.mxu2  ;;  %v2134_v0 = vpop.f32.mrf.mxu3 }
 0x370   : > { %2155 = vst.msk [vmem:[%s2681_s5 + $0x8] sm:$0xff] %vm2153_vm3, %v2146_v12  ;;  %v2142_v56 = vadd.f32 %v2128_v36, %v2047_v5  ;;  %v2144_v28 = vadd.f32 %v2134_v0, %v2049_v34 }
 0x371   : > { %2157 = vst.msk [vmem:[%s2681_s5 + $0x18] sm:$0xff] %vm2153_vm3, %v2148_v49 }
 0x372   : > { %v2150_v13 = vmax.f32 %v2142_v56, 0.0  ;;  %v2152_v26 = vmax.f32 %v2144_v28, 0.0 }
 0x374   : > { %2159 = vst.msk [vmem:[%s2681_s5 + $0x28] sm:$0xff] %vm2153_vm3, %v2150_v13 }
 0x375   : > { %2161 = vst.msk [vmem:[%s2681_s5 + $0x38] sm:$0xff] %vm2153_vm3, %v2152_v26 }
 0x376 PF: > { %s14_s19 = sadd.s32 1, %s2605_s19   ;;  %s3357_s15 = smov %s2597_s17 }
 0x377   : > { %p11_p1 = scmp.ge.s32.totalorder %s14_s19, 8   ;;  %s3358_s16 = smov %s2601_s18 }
 0x378   : > { %s3359_s17 = smov %s3362_s20  ;;  %s3360_s18 = smov %s3366_s21 }
 0x379   :  { %13 = sbr.rel (!%p11_p1) target bundleno = 3 (0x3), region = 118 }

</bundles_post_ra>
